<compile_context>
chip_gen: v6e
topology: v6e:2x2x1
jax: 0.10.0
libtpu: 0.0.40
codegen_flags: <defaults>
</compile_context>

<pallas_src>
import functools

import jax
import jax.numpy as jnp
from jax.experimental import pallas as pl
from jax.experimental.pallas import tpu as pltpu  # noqa: F401  (TPU backend)


# ----------------------------------------------------------------------------
# Fused kernel: all LSTM layers + fc head, single invocation, no grid.
# Gate order matches PyTorch: i, f, g, o.  Combined bias = b_ih + b_hh.
# ----------------------------------------------------------------------------
def _make_kernel(num_layers, hidden_size, seq_len, mxu_dtype):
    H = hidden_size
    T = seq_len
    f32 = jnp.float32

    def kernel(x_ref, *refs):
        layer_refs = refs[: 3 * num_layers]
        fc_w_ref = refs[3 * num_layers]          # (H, O)
        fc_b_ref = refs[3 * num_layers + 1]      # (1, O)
        out_ref = refs[3 * num_layers + 2]       # (B, O)

        B = x_ref.shape[0]
        xv = x_ref[...].astype(f32)              # (B, T, I), one VMEM load

        # Time-major 2-D view of the layer input: row index = t*B + b.
        x2d = jnp.concatenate([xv[:, t, :] for t in range(T)], axis=0)  # (T*B, I)

        h = jnp.zeros((B, H), f32)
        for l in range(num_layers):
            wih = layer_refs[3 * l][...].astype(mxu_dtype)        # (F, 4H)
            whh = layer_refs[3 * l + 1][...].astype(mxu_dtype)    # (H, 4H)
            b = layer_refs[3 * l + 2][...]                        # (1, 4H) f32

            # Hoisted, T-parallel input projection with the bias folded in:
            # one MXU matmul per layer instead of one per timestep.
            gx = jnp.dot(x2d.astype(mxu_dtype), wih,
                         preferred_element_type=f32) + b          # (T*B, 4H)

            h = jnp.zeros((B, H), f32)
            c = jnp.zeros((B, H), f32)
            hs = []
            for t in range(T):                   # recurrence: only h @ W_hh left
                g = gx[t * B:(t + 1) * B, :] + jnp.dot(
                    h.astype(mxu_dtype), whh, preferred_element_type=f32)
                i_g = jax.nn.sigmoid(g[:, 0 * H:1 * H])
                f_g = jax.nn.sigmoid(g[:, 1 * H:2 * H])
                g_g = jnp.tanh(g[:, 2 * H:3 * H])
                o_g = jax.nn.sigmoid(g[:, 3 * H:4 * H])
                c = f_g * c + i_g * g_g          # f32 state / gate math
                h = o_g * jnp.tanh(c)
                hs.append(h)

            if l + 1 < num_layers:
                # Next layer's input sequence, still time-major (never hits HBM).
                x2d = jnp.concatenate(hs, axis=0)                  # (T*B, H)

        # fc head on the last timestep of the top layer, fused in-kernel.
        out = jnp.dot(h.astype(mxu_dtype), fc_w_ref[...].astype(mxu_dtype),
                      preferred_element_type=f32) + fc_b_ref[...]
        out_ref[...] = out.astype(out_ref.dtype)

    return kernel


# ----------------------------------------------------------------------------
# Forward pass (matches StockLSTM.forward): zero initial h/c, stacked LSTM,
# fc applied to the last timestep of the top layer.
# kernel_params layout (pre-transposed once, see prepare_kernel_params):
#   [wih_0 (I,4H), whh_0 (H,4H), b_0 (1,4H), ..., fc_w (H,O), fc_b (1,O)]
# ----------------------------------------------------------------------------
def stock_lstm_forward(x, kernel_params, mxu_dtype=jnp.float32):
    num_layers = (len(kernel_params) - 2) // 3
    hidden_size = kernel_params[1].shape[0]       # whh_0: (H, 4H)
    B, T, _ = x.shape
    O = kernel_params[-1].shape[-1]

    kernel = _make_kernel(num_layers, hidden_size, T, mxu_dtype)
    # Single invocation, no grid: all operands become full-array VMEM blocks.
    return pl.pallas_call(
        kernel,
        out_shape=jax.ShapeDtypeStruct((B, O), jnp.float32),
    )(x, *kernel_params)


stock_lstm_forward_jit = jax.jit(stock_lstm_forward,
                                 static_argnames=("mxu_dtype",))


def prepare_kernel_params(lstm_params, fc_params):
    """One-time conversion to kernel layout (done outside the jitted forward)."""
    flat = []
    for (w_ih, w_hh, b_ih, b_hh) in lstm_params:
        flat.append(jnp.asarray(w_ih.T))            # (in, 4H)
        flat.append(jnp.asarray(w_hh.T))            # (H, 4H)
        flat.append((b_ih + b_hh)[None, :])         # (1, 4H) combined bias
    fc_w, fc_b = fc_params
    flat.append(jnp.asarray(fc_w.T))                # (H, O)
    flat.append(fc_b[None, :])                      # (1, O)
    return tuple(flat)


# ----------------------------------------------------------------------------
# Parameter init (deterministic, mirrors the PyTorch module's shapes / init).
# ----------------------------------------------------------------------------
def init_params(key, input_size, hidden_size, output_size, num_layers):
    lstm_params = []
    for layer in range(num_layers):
        in_sz = input_size if layer == 0 else hidden_size
        key, k1, k2, k3, k4 = jax.random.split(key, 5)
        # PyTorch shapes: weight_ih (4H, in), weight_hh (4H, H), biases (4H,)
        w_ih = jax.random.uniform(k1, (4 * hidden_size, in_sz),
                                  jnp.float32, -0.1, 0.1)
        w_hh = jax.random.uniform(k2, (4 * hidden_size, hidden_size),
                                  jnp.float32, -0.1, 0.1)
        b_ih = jax.random.uniform(k3, (4 * hidden_size,), jnp.float32, -0.1, 0.1)
        b_hh = jax.random.uniform(k4, (4 * hidden_size,), jnp.float32, -0.1, 0.1)
        lstm_params.append((w_ih, w_hh, b_ih, b_hh))
    key, kw = jax.random.split(key)
    std = (2.0 / (hidden_size + output_size)) ** 0.5    # xavier_normal_
    fc_w = std * jax.random.normal(kw, (output_size, hidden_size), jnp.float32)
    fc_b = jnp.zeros((output_size,), jnp.float32)       # constant_(bias, 0)
    return lstm_params, (fc_w, fc_b)


# ----------------------------------------------------------------------------
# Pure-JAX reference (lax.scan) for correctness checking.
# ----------------------------------------------------------------------------
def reference_forward(x, lstm_params, fc_params):
    B = x.shape[0]
    seq = jnp.transpose(x, (1, 0, 2)).astype(jnp.float32)    # (T, B, I)
    for (w_ih, w_hh, b_ih, b_hh) in lstm_params:
        H = w_hh.shape[1]

        def step(carry, x_t):
            h, c = carry
            gates = x_t @ w_ih.T + h @ w_hh.T + b_ih + b_hh
            i = jax.nn.sigmoid(gates[:, 0 * H:1 * H])
            f = jax.nn.sigmoid(gates[:, 1 * H:2 * H])
            g = jnp.tanh(gates[:, 2 * H:3 * H])
            o = jax.nn.sigmoid(gates[:, 3 * H:4 * H])
            c = f * c + i * g
            h = o * jnp.tanh(c)
            return (h, c), h

        init = (jnp.zeros((B, H), jnp.float32), jnp.zeros((B, H), jnp.float32))
        _, seq = jax.lax.scan(step, init, seq)
    fc_w, fc_b = fc_params
    return seq[-1] @ fc_w.T + fc_b


if __name__ == "__main__":
    # Small shapes consistent with StockLSTM(input_size=4, hidden_size=32,
    # output_size=4, num_layers=2), batch=2, seq_len=8.
    B, T = 2, 8
    input_size, hidden_size, output_size, num_layers = 4, 32, 4, 2

    key = jax.random.PRNGKey(0)
    key, kx = jax.random.split(key)
    x = jax.random.normal(kx, (B, T, input_size), jnp.float32)

    lstm_params, fc_params = init_params(
        key, input_size, hidden_size, output_size, num_layers)
    kernel_params = prepare_kernel_params(lstm_params, fc_params)

    # f32 MXU operands here so the 1e-5 check holds; use mxu_dtype=jnp.bfloat16
    # on v6e/v7x at realistic hidden sizes (loosen tolerance accordingly).
    out = stock_lstm_forward_jit(x, kernel_params, mxu_dtype=jnp.float32)
    out = jax.block_until_ready(out)

    ref = reference_forward(x, lstm_params, fc_params)
    assert out.shape == (B, output_size)
    assert jnp.allclose(out, ref, atol=1e-5, rtol=1e-5), (out, ref)

    print("KERNEL_OK")
</pallas_src>

<mosaic_0001>
module attributes {stable_mosaic.version = 11 : i64} {
  func.func @kernel(%arg0: memref<2x8x4xf32, #tpu.memory_space<vmem>>, %arg1: memref<4x128xf32, #tpu.memory_space<vmem>>, %arg2: memref<32x128xf32, #tpu.memory_space<vmem>>, %arg3: memref<1x128xf32, #tpu.memory_space<vmem>>, %arg4: memref<32x128xf32, #tpu.memory_space<vmem>>, %arg5: memref<32x128xf32, #tpu.memory_space<vmem>>, %arg6: memref<1x128xf32, #tpu.memory_space<vmem>>, %arg7: memref<32x4xf32, #tpu.memory_space<vmem>>, %arg8: memref<1x4xf32, #tpu.memory_space<vmem>>, %arg9: memref<2x4xf32, #tpu.memory_space<vmem>>) attributes {dimension_semantics = [], scalar_prefetch = 0 : i64, scratch_operands = 0 : i64, tpu.core_type = #tpu.core_type<tc>} {
    %c0 = arith.constant 0 : index
    %c0_0 = arith.constant 0 : index
    %c0_1 = arith.constant 0 : index
    %0 = vector.load %arg0[%c0, %c0_0, %c0_1] : memref<2x8x4xf32, #tpu.memory_space<vmem>>, vector<2x8x4xf32>
    %1 = vector.extract_strided_slice %0 {offsets = [0, 0, 0], sizes = [2, 1, 4], strides = [1, 1, 1]} : vector<2x8x4xf32> to vector<2x1x4xf32>
    %2 = vector.shape_cast %1 : vector<2x1x4xf32> to vector<2x4xf32>
    %3 = vector.extract_strided_slice %0 {offsets = [0, 1, 0], sizes = [2, 1, 4], strides = [1, 1, 1]} : vector<2x8x4xf32> to vector<2x1x4xf32>
    %4 = vector.shape_cast %3 : vector<2x1x4xf32> to vector<2x4xf32>
    %5 = vector.extract_strided_slice %0 {offsets = [0, 2, 0], sizes = [2, 1, 4], strides = [1, 1, 1]} : vector<2x8x4xf32> to vector<2x1x4xf32>
    %6 = vector.shape_cast %5 : vector<2x1x4xf32> to vector<2x4xf32>
    %7 = vector.extract_strided_slice %0 {offsets = [0, 3, 0], sizes = [2, 1, 4], strides = [1, 1, 1]} : vector<2x8x4xf32> to vector<2x1x4xf32>
    %8 = vector.shape_cast %7 : vector<2x1x4xf32> to vector<2x4xf32>
    %9 = vector.extract_strided_slice %0 {offsets = [0, 4, 0], sizes = [2, 1, 4], strides = [1, 1, 1]} : vector<2x8x4xf32> to vector<2x1x4xf32>
    %10 = vector.shape_cast %9 : vector<2x1x4xf32> to vector<2x4xf32>
    %11 = vector.extract_strided_slice %0 {offsets = [0, 5, 0], sizes = [2, 1, 4], strides = [1, 1, 1]} : vector<2x8x4xf32> to vector<2x1x4xf32>
    %12 = vector.shape_cast %11 : vector<2x1x4xf32> to vector<2x4xf32>
    %13 = vector.extract_strided_slice %0 {offsets = [0, 6, 0], sizes = [2, 1, 4], strides = [1, 1, 1]} : vector<2x8x4xf32> to vector<2x1x4xf32>
    %14 = vector.shape_cast %13 : vector<2x1x4xf32> to vector<2x4xf32>
    %15 = vector.extract_strided_slice %0 {offsets = [0, 7, 0], sizes = [2, 1, 4], strides = [1, 1, 1]} : vector<2x8x4xf32> to vector<2x1x4xf32>
    %16 = vector.shape_cast %15 : vector<2x1x4xf32> to vector<2x4xf32>
    %17 = tpu.concatenate %2, %4, %6, %8, %10, %12, %14, %16 in 0 : vector<2x4xf32>, vector<2x4xf32>, vector<2x4xf32>, vector<2x4xf32>, vector<2x4xf32>, vector<2x4xf32>, vector<2x4xf32>, vector<2x4xf32> -> vector<16x4xf32>
    %c0_2 = arith.constant 0 : index
    %c0_3 = arith.constant 0 : index
    %18 = vector.load %arg1[%c0_2, %c0_3] : memref<4x128xf32, #tpu.memory_space<vmem>>, vector<4x128xf32>
    %c0_4 = arith.constant 0 : index
    %c0_5 = arith.constant 0 : index
    %19 = vector.load %arg2[%c0_4, %c0_5] : memref<32x128xf32, #tpu.memory_space<vmem>>, vector<32x128xf32>
    %c0_6 = arith.constant 0 : index
    %c0_7 = arith.constant 0 : index
    %20 = vector.load %arg3[%c0_6, %c0_7] : memref<1x128xf32, #tpu.memory_space<vmem>>, vector<1x128xf32>
    %cst = arith.constant dense<0.000000e+00> : vector<16x128xf32>
    %21 = tpu.matmul %17, %18, %cst {dimension_numbers = #tpu.dot_dimension_numbers<[1], [0], [0], [1], [0, 0, 1, 1], [], []>} : vector<16x4xf32>, vector<4x128xf32>, vector<16x128xf32> -> vector<16x128xf32>
    %22 = vector.broadcast %20 : vector<1x128xf32> to vector<16x128xf32>
    %23 = arith.addf %21, %22 : vector<16x128xf32>
    %cst_8 = arith.constant 0.000000e+00 : f32
    %24 = vector.broadcast %cst_8 : f32 to vector<2x32xf32>
    %cst_9 = arith.constant 0.000000e+00 : f32
    %25 = vector.broadcast %cst_9 : f32 to vector<2x32xf32>
    %26 = vector.extract_strided_slice %23 {offsets = [0, 0], sizes = [2, 128], strides = [1, 1]} : vector<16x128xf32> to vector<2x128xf32>
    %cst_10 = arith.constant dense<0.000000e+00> : vector<2x128xf32>
    %27 = tpu.matmul %24, %19, %cst_10 {dimension_numbers = #tpu.dot_dimension_numbers<[1], [0], [0], [1], [0, 0, 1, 1], [], []>} : vector<2x32xf32>, vector<32x128xf32>, vector<2x128xf32> -> vector<2x128xf32>
    %28 = arith.addf %26, %27 : vector<2x128xf32>
    %29 = vector.extract_strided_slice %28 {offsets = [0, 0], sizes = [2, 32], strides = [1, 1]} : vector<2x128xf32> to vector<2x32xf32>
    %30 = arith.negf %29 : vector<2x32xf32>
    %31 = math.exp %30 : vector<2x32xf32>
    %cst_11 = arith.constant 1.000000e+00 : f32
    %32 = vector.broadcast %cst_11 : f32 to vector<2x32xf32>
    %33 = arith.addf %32, %31 : vector<2x32xf32>
    %34 = arith.divf %32, %33 : vector<2x32xf32>
    %35 = vector.extract_strided_slice %28 {offsets = [0, 32], sizes = [2, 32], strides = [1, 1]} : vector<2x128xf32> to vector<2x32xf32>
    %36 = arith.negf %35 : vector<2x32xf32>
    %37 = math.exp %36 : vector<2x32xf32>
    %cst_12 = arith.constant 1.000000e+00 : f32
    %38 = vector.broadcast %cst_12 : f32 to vector<2x32xf32>
    %39 = arith.addf %38, %37 : vector<2x32xf32>
    %40 = arith.divf %38, %39 : vector<2x32xf32>
    %41 = vector.extract_strided_slice %28 {offsets = [0, 64], sizes = [2, 32], strides = [1, 1]} : vector<2x128xf32> to vector<2x32xf32>
    %42 = math.tanh %41 : vector<2x32xf32>
    %43 = vector.extract_strided_slice %28 {offsets = [0, 96], sizes = [2, 32], strides = [1, 1]} : vector<2x128xf32> to vector<2x32xf32>
    %44 = arith.negf %43 : vector<2x32xf32>
    %45 = math.exp %44 : vector<2x32xf32>
    %cst_13 = arith.constant 1.000000e+00 : f32
    %46 = vector.broadcast %cst_13 : f32 to vector<2x32xf32>
    %47 = arith.addf %46, %45 : vector<2x32xf32>
    %48 = arith.divf %46, %47 : vector<2x32xf32>
    %49 = arith.mulf %40, %25 : vector<2x32xf32>
    %50 = arith.mulf %34, %42 : vector<2x32xf32>
    %51 = arith.addf %49, %50 : vector<2x32xf32>
    %52 = math.tanh %51 : vector<2x32xf32>
    %53 = arith.mulf %48, %52 : vector<2x32xf32>
    %54 = vector.extract_strided_slice %23 {offsets = [2, 0], sizes = [2, 128], strides = [1, 1]} : vector<16x128xf32> to vector<2x128xf32>
    %cst_14 = arith.constant dense<0.000000e+00> : vector<2x128xf32>
    %55 = tpu.matmul %53, %19, %cst_14 {dimension_numbers = #tpu.dot_dimension_numbers<[1], [0], [0], [1], [0, 0, 1, 1], [], []>} : vector<2x32xf32>, vector<32x128xf32>, vector<2x128xf32> -> vector<2x128xf32>
    %56 = arith.addf %54, %55 : vector<2x128xf32>
    %57 = vector.extract_strided_slice %56 {offsets = [0, 0], sizes = [2, 32], strides = [1, 1]} : vector<2x128xf32> to vector<2x32xf32>
    %58 = arith.negf %57 : vector<2x32xf32>
    %59 = math.exp %58 : vector<2x32xf32>
    %cst_15 = arith.constant 1.000000e+00 : f32
    %60 = vector.broadcast %cst_15 : f32 to vector<2x32xf32>
    %61 = arith.addf %60, %59 : vector<2x32xf32>
    %62 = arith.divf %60, %61 : vector<2x32xf32>
    %63 = vector.extract_strided_slice %56 {offsets = [0, 32], sizes = [2, 32], strides = [1, 1]} : vector<2x128xf32> to vector<2x32xf32>
    %64 = arith.negf %63 : vector<2x32xf32>
    %65 = math.exp %64 : vector<2x32xf32>
    %cst_16 = arith.constant 1.000000e+00 : f32
    %66 = vector.broadcast %cst_16 : f32 to vector<2x32xf32>
    %67 = arith.addf %66, %65 : vector<2x32xf32>
    %68 = arith.divf %66, %67 : vector<2x32xf32>
    %69 = vector.extract_strided_slice %56 {offsets = [0, 64], sizes = [2, 32], strides = [1, 1]} : vector<2x128xf32> to vector<2x32xf32>
    %70 = math.tanh %69 : vector<2x32xf32>
    %71 = vector.extract_strided_slice %56 {offsets = [0, 96], sizes = [2, 32], strides = [1, 1]} : vector<2x128xf32> to vector<2x32xf32>
    %72 = arith.negf %71 : vector<2x32xf32>
    %73 = math.exp %72 : vector<2x32xf32>
    %cst_17 = arith.constant 1.000000e+00 : f32
    %74 = vector.broadcast %cst_17 : f32 to vector<2x32xf32>
    %75 = arith.addf %74, %73 : vector<2x32xf32>
    %76 = arith.divf %74, %75 : vector<2x32xf32>
    %77 = arith.mulf %68, %51 : vector<2x32xf32>
    %78 = arith.mulf %62, %70 : vector<2x32xf32>
    %79 = arith.addf %77, %78 : vector<2x32xf32>
    %80 = math.tanh %79 : vector<2x32xf32>
    %81 = arith.mulf %76, %80 : vector<2x32xf32>
    %82 = vector.extract_strided_slice %23 {offsets = [4, 0], sizes = [2, 128], strides = [1, 1]} : vector<16x128xf32> to vector<2x128xf32>
    %cst_18 = arith.constant dense<0.000000e+00> : vector<2x128xf32>
    %83 = tpu.matmul %81, %19, %cst_18 {dimension_numbers = #tpu.dot_dimension_numbers<[1], [0], [0], [1], [0, 0, 1, 1], [], []>} : vector<2x32xf32>, vector<32x128xf32>, vector<2x128xf32> -> vector<2x128xf32>
    %84 = arith.addf %82, %83 : vector<2x128xf32>
    %85 = vector.extract_strided_slice %84 {offsets = [0, 0], sizes = [2, 32], strides = [1, 1]} : vector<2x128xf32> to vector<2x32xf32>
    %86 = arith.negf %85 : vector<2x32xf32>
    %87 = math.exp %86 : vector<2x32xf32>
    %cst_19 = arith.constant 1.000000e+00 : f32
    %88 = vector.broadcast %cst_19 : f32 to vector<2x32xf32>
    %89 = arith.addf %88, %87 : vector<2x32xf32>
    %90 = arith.divf %88, %89 : vector<2x32xf32>
    %91 = vector.extract_strided_slice %84 {offsets = [0, 32], sizes = [2, 32], strides = [1, 1]} : vector<2x128xf32> to vector<2x32xf32>
    %92 = arith.negf %91 : vector<2x32xf32>
    %93 = math.exp %92 : vector<2x32xf32>
    %cst_20 = arith.constant 1.000000e+00 : f32
    %94 = vector.broadcast %cst_20 : f32 to vector<2x32xf32>
    %95 = arith.addf %94, %93 : vector<2x32xf32>
    %96 = arith.divf %94, %95 : vector<2x32xf32>
    %97 = vector.extract_strided_slice %84 {offsets = [0, 64], sizes = [2, 32], strides = [1, 1]} : vector<2x128xf32> to vector<2x32xf32>
    %98 = math.tanh %97 : vector<2x32xf32>
    %99 = vector.extract_strided_slice %84 {offsets = [0, 96], sizes = [2, 32], strides = [1, 1]} : vector<2x128xf32> to vector<2x32xf32>
    %100 = arith.negf %99 : vector<2x32xf32>
    %101 = math.exp %100 : vector<2x32xf32>
    %cst_21 = arith.constant 1.000000e+00 : f32
    %102 = vector.broadcast %cst_21 : f32 to vector<2x32xf32>
    %103 = arith.addf %102, %101 : vector<2x32xf32>
    %104 = arith.divf %102, %103 : vector<2x32xf32>
    %105 = arith.mulf %96, %79 : vector<2x32xf32>
    %106 = arith.mulf %90, %98 : vector<2x32xf32>
    %107 = arith.addf %105, %106 : vector<2x32xf32>
    %108 = math.tanh %107 : vector<2x32xf32>
    %109 = arith.mulf %104, %108 : vector<2x32xf32>
    %110 = vector.extract_strided_slice %23 {offsets = [6, 0], sizes = [2, 128], strides = [1, 1]} : vector<16x128xf32> to vector<2x128xf32>
    %cst_22 = arith.constant dense<0.000000e+00> : vector<2x128xf32>
    %111 = tpu.matmul %109, %19, %cst_22 {dimension_numbers = #tpu.dot_dimension_numbers<[1], [0], [0], [1], [0, 0, 1, 1], [], []>} : vector<2x32xf32>, vector<32x128xf32>, vector<2x128xf32> -> vector<2x128xf32>
    %112 = arith.addf %110, %111 : vector<2x128xf32>
    %113 = vector.extract_strided_slice %112 {offsets = [0, 0], sizes = [2, 32], strides = [1, 1]} : vector<2x128xf32> to vector<2x32xf32>
    %114 = arith.negf %113 : vector<2x32xf32>
    %115 = math.exp %114 : vector<2x32xf32>
    %cst_23 = arith.constant 1.000000e+00 : f32
    %116 = vector.broadcast %cst_23 : f32 to vector<2x32xf32>
    %117 = arith.addf %116, %115 : vector<2x32xf32>
    %118 = arith.divf %116, %117 : vector<2x32xf32>
    %119 = vector.extract_strided_slice %112 {offsets = [0, 32], sizes = [2, 32], strides = [1, 1]} : vector<2x128xf32> to vector<2x32xf32>
    %120 = arith.negf %119 : vector<2x32xf32>
    %121 = math.exp %120 : vector<2x32xf32>
    %cst_24 = arith.constant 1.000000e+00 : f32
    %122 = vector.broadcast %cst_24 : f32 to vector<2x32xf32>
    %123 = arith.addf %122, %121 : vector<2x32xf32>
    %124 = arith.divf %122, %123 : vector<2x32xf32>
    %125 = vector.extract_strided_slice %112 {offsets = [0, 64], sizes = [2, 32], strides = [1, 1]} : vector<2x128xf32> to vector<2x32xf32>
    %126 = math.tanh %125 : vector<2x32xf32>
    %127 = vector.extract_strided_slice %112 {offsets = [0, 96], sizes = [2, 32], strides = [1, 1]} : vector<2x128xf32> to vector<2x32xf32>
    %128 = arith.negf %127 : vector<2x32xf32>
    %129 = math.exp %128 : vector<2x32xf32>
    %cst_25 = arith.constant 1.000000e+00 : f32
    %130 = vector.broadcast %cst_25 : f32 to vector<2x32xf32>
    %131 = arith.addf %130, %129 : vector<2x32xf32>
    %132 = arith.divf %130, %131 : vector<2x32xf32>
    %133 = arith.mulf %124, %107 : vector<2x32xf32>
    %134 = arith.mulf %118, %126 : vector<2x32xf32>
    %135 = arith.addf %133, %134 : vector<2x32xf32>
    %136 = math.tanh %135 : vector<2x32xf32>
    %137 = arith.mulf %132, %136 : vector<2x32xf32>
    %138 = vector.extract_strided_slice %23 {offsets = [8, 0], sizes = [2, 128], strides = [1, 1]} : vector<16x128xf32> to vector<2x128xf32>
    %cst_26 = arith.constant dense<0.000000e+00> : vector<2x128xf32>
    %139 = tpu.matmul %137, %19, %cst_26 {dimension_numbers = #tpu.dot_dimension_numbers<[1], [0], [0], [1], [0, 0, 1, 1], [], []>} : vector<2x32xf32>, vector<32x128xf32>, vector<2x128xf32> -> vector<2x128xf32>
    %140 = arith.addf %138, %139 : vector<2x128xf32>
    %141 = vector.extract_strided_slice %140 {offsets = [0, 0], sizes = [2, 32], strides = [1, 1]} : vector<2x128xf32> to vector<2x32xf32>
    %142 = arith.negf %141 : vector<2x32xf32>
    %143 = math.exp %142 : vector<2x32xf32>
    %cst_27 = arith.constant 1.000000e+00 : f32
    %144 = vector.broadcast %cst_27 : f32 to vector<2x32xf32>
    %145 = arith.addf %144, %143 : vector<2x32xf32>
    %146 = arith.divf %144, %145 : vector<2x32xf32>
    %147 = vector.extract_strided_slice %140 {offsets = [0, 32], sizes = [2, 32], strides = [1, 1]} : vector<2x128xf32> to vector<2x32xf32>
    %148 = arith.negf %147 : vector<2x32xf32>
    %149 = math.exp %148 : vector<2x32xf32>
    %cst_28 = arith.constant 1.000000e+00 : f32
    %150 = vector.broadcast %cst_28 : f32 to vector<2x32xf32>
    %151 = arith.addf %150, %149 : vector<2x32xf32>
    %152 = arith.divf %150, %151 : vector<2x32xf32>
    %153 = vector.extract_strided_slice %140 {offsets = [0, 64], sizes = [2, 32], strides = [1, 1]} : vector<2x128xf32> to vector<2x32xf32>
    %154 = math.tanh %153 : vector<2x32xf32>
    %155 = vector.extract_strided_slice %140 {offsets = [0, 96], sizes = [2, 32], strides = [1, 1]} : vector<2x128xf32> to vector<2x32xf32>
    %156 = arith.negf %155 : vector<2x32xf32>
    %157 = math.exp %156 : vector<2x32xf32>
    %cst_29 = arith.constant 1.000000e+00 : f32
    %158 = vector.broadcast %cst_29 : f32 to vector<2x32xf32>
    %159 = arith.addf %158, %157 : vector<2x32xf32>
    %160 = arith.divf %158, %159 : vector<2x32xf32>
    %161 = arith.mulf %152, %135 : vector<2x32xf32>
    %162 = arith.mulf %146, %154 : vector<2x32xf32>
    %163 = arith.addf %161, %162 : vector<2x32xf32>
    %164 = math.tanh %163 : vector<2x32xf32>
    %165 = arith.mulf %160, %164 : vector<2x32xf32>
    %166 = vector.extract_strided_slice %23 {offsets = [10, 0], sizes = [2, 128], strides = [1, 1]} : vector<16x128xf32> to vector<2x128xf32>
    %cst_30 = arith.constant dense<0.000000e+00> : vector<2x128xf32>
    %167 = tpu.matmul %165, %19, %cst_30 {dimension_numbers = #tpu.dot_dimension_numbers<[1], [0], [0], [1], [0, 0, 1, 1], [], []>} : vector<2x32xf32>, vector<32x128xf32>, vector<2x128xf32> -> vector<2x128xf32>
    %168 = arith.addf %166, %167 : vector<2x128xf32>
    %169 = vector.extract_strided_slice %168 {offsets = [0, 0], sizes = [2, 32], strides = [1, 1]} : vector<2x128xf32> to vector<2x32xf32>
    %170 = arith.negf %169 : vector<2x32xf32>
    %171 = math.exp %170 : vector<2x32xf32>
    %cst_31 = arith.constant 1.000000e+00 : f32
    %172 = vector.broadcast %cst_31 : f32 to vector<2x32xf32>
    %173 = arith.addf %172, %171 : vector<2x32xf32>
    %174 = arith.divf %172, %173 : vector<2x32xf32>
    %175 = vector.extract_strided_slice %168 {offsets = [0, 32], sizes = [2, 32], strides = [1, 1]} : vector<2x128xf32> to vector<2x32xf32>
    %176 = arith.negf %175 : vector<2x32xf32>
    %177 = math.exp %176 : vector<2x32xf32>
    %cst_32 = arith.constant 1.000000e+00 : f32
    %178 = vector.broadcast %cst_32 : f32 to vector<2x32xf32>
    %179 = arith.addf %178, %177 : vector<2x32xf32>
    %180 = arith.divf %178, %179 : vector<2x32xf32>
    %181 = vector.extract_strided_slice %168 {offsets = [0, 64], sizes = [2, 32], strides = [1, 1]} : vector<2x128xf32> to vector<2x32xf32>
    %182 = math.tanh %181 : vector<2x32xf32>
    %183 = vector.extract_strided_slice %168 {offsets = [0, 96], sizes = [2, 32], strides = [1, 1]} : vector<2x128xf32> to vector<2x32xf32>
    %184 = arith.negf %183 : vector<2x32xf32>
    %185 = math.exp %184 : vector<2x32xf32>
    %cst_33 = arith.constant 1.000000e+00 : f32
    %186 = vector.broadcast %cst_33 : f32 to vector<2x32xf32>
    %187 = arith.addf %186, %185 : vector<2x32xf32>
    %188 = arith.divf %186, %187 : vector<2x32xf32>
    %189 = arith.mulf %180, %163 : vector<2x32xf32>
    %190 = arith.mulf %174, %182 : vector<2x32xf32>
    %191 = arith.addf %189, %190 : vector<2x32xf32>
    %192 = math.tanh %191 : vector<2x32xf32>
    %193 = arith.mulf %188, %192 : vector<2x32xf32>
    %194 = vector.extract_strided_slice %23 {offsets = [12, 0], sizes = [2, 128], strides = [1, 1]} : vector<16x128xf32> to vector<2x128xf32>
    %cst_34 = arith.constant dense<0.000000e+00> : vector<2x128xf32>
    %195 = tpu.matmul %193, %19, %cst_34 {dimension_numbers = #tpu.dot_dimension_numbers<[1], [0], [0], [1], [0, 0, 1, 1], [], []>} : vector<2x32xf32>, vector<32x128xf32>, vector<2x128xf32> -> vector<2x128xf32>
    %196 = arith.addf %194, %195 : vector<2x128xf32>
    %197 = vector.extract_strided_slice %196 {offsets = [0, 0], sizes = [2, 32], strides = [1, 1]} : vector<2x128xf32> to vector<2x32xf32>
    %198 = arith.negf %197 : vector<2x32xf32>
    %199 = math.exp %198 : vector<2x32xf32>
    %cst_35 = arith.constant 1.000000e+00 : f32
    %200 = vector.broadcast %cst_35 : f32 to vector<2x32xf32>
    %201 = arith.addf %200, %199 : vector<2x32xf32>
    %202 = arith.divf %200, %201 : vector<2x32xf32>
    %203 = vector.extract_strided_slice %196 {offsets = [0, 32], sizes = [2, 32], strides = [1, 1]} : vector<2x128xf32> to vector<2x32xf32>
    %204 = arith.negf %203 : vector<2x32xf32>
    %205 = math.exp %204 : vector<2x32xf32>
    %cst_36 = arith.constant 1.000000e+00 : f32
    %206 = vector.broadcast %cst_36 : f32 to vector<2x32xf32>
    %207 = arith.addf %206, %205 : vector<2x32xf32>
    %208 = arith.divf %206, %207 : vector<2x32xf32>
    %209 = vector.extract_strided_slice %196 {offsets = [0, 64], sizes = [2, 32], strides = [1, 1]} : vector<2x128xf32> to vector<2x32xf32>
    %210 = math.tanh %209 : vector<2x32xf32>
    %211 = vector.extract_strided_slice %196 {offsets = [0, 96], sizes = [2, 32], strides = [1, 1]} : vector<2x128xf32> to vector<2x32xf32>
    %212 = arith.negf %211 : vector<2x32xf32>
    %213 = math.exp %212 : vector<2x32xf32>
    %cst_37 = arith.constant 1.000000e+00 : f32
    %214 = vector.broadcast %cst_37 : f32 to vector<2x32xf32>
    %215 = arith.addf %214, %213 : vector<2x32xf32>
    %216 = arith.divf %214, %215 : vector<2x32xf32>
    %217 = arith.mulf %208, %191 : vector<2x32xf32>
    %218 = arith.mulf %202, %210 : vector<2x32xf32>
    %219 = arith.addf %217, %218 : vector<2x32xf32>
    %220 = math.tanh %219 : vector<2x32xf32>
    %221 = arith.mulf %216, %220 : vector<2x32xf32>
    %222 = vector.extract_strided_slice %23 {offsets = [14, 0], sizes = [2, 128], strides = [1, 1]} : vector<16x128xf32> to vector<2x128xf32>
    %cst_38 = arith.constant dense<0.000000e+00> : vector<2x128xf32>
    %223 = tpu.matmul %221, %19, %cst_38 {dimension_numbers = #tpu.dot_dimension_numbers<[1], [0], [0], [1], [0, 0, 1, 1], [], []>} : vector<2x32xf32>, vector<32x128xf32>, vector<2x128xf32> -> vector<2x128xf32>
    %224 = arith.addf %222, %223 : vector<2x128xf32>
    %225 = vector.extract_strided_slice %224 {offsets = [0, 0], sizes = [2, 32], strides = [1, 1]} : vector<2x128xf32> to vector<2x32xf32>
    %226 = arith.negf %225 : vector<2x32xf32>
    %227 = math.exp %226 : vector<2x32xf32>
    %cst_39 = arith.constant 1.000000e+00 : f32
    %228 = vector.broadcast %cst_39 : f32 to vector<2x32xf32>
    %229 = arith.addf %228, %227 : vector<2x32xf32>
    %230 = arith.divf %228, %229 : vector<2x32xf32>
    %231 = vector.extract_strided_slice %224 {offsets = [0, 32], sizes = [2, 32], strides = [1, 1]} : vector<2x128xf32> to vector<2x32xf32>
    %232 = arith.negf %231 : vector<2x32xf32>
    %233 = math.exp %232 : vector<2x32xf32>
    %cst_40 = arith.constant 1.000000e+00 : f32
    %234 = vector.broadcast %cst_40 : f32 to vector<2x32xf32>
    %235 = arith.addf %234, %233 : vector<2x32xf32>
    %236 = arith.divf %234, %235 : vector<2x32xf32>
    %237 = vector.extract_strided_slice %224 {offsets = [0, 64], sizes = [2, 32], strides = [1, 1]} : vector<2x128xf32> to vector<2x32xf32>
    %238 = math.tanh %237 : vector<2x32xf32>
    %239 = vector.extract_strided_slice %224 {offsets = [0, 96], sizes = [2, 32], strides = [1, 1]} : vector<2x128xf32> to vector<2x32xf32>
    %240 = arith.negf %239 : vector<2x32xf32>
    %241 = math.exp %240 : vector<2x32xf32>
    %cst_41 = arith.constant 1.000000e+00 : f32
    %242 = vector.broadcast %cst_41 : f32 to vector<2x32xf32>
    %243 = arith.addf %242, %241 : vector<2x32xf32>
    %244 = arith.divf %242, %243 : vector<2x32xf32>
    %245 = arith.mulf %236, %219 : vector<2x32xf32>
    %246 = arith.mulf %230, %238 : vector<2x32xf32>
    %247 = arith.addf %245, %246 : vector<2x32xf32>
    %248 = math.tanh %247 : vector<2x32xf32>
    %249 = arith.mulf %244, %248 : vector<2x32xf32>
    %250 = tpu.concatenate %53, %81, %109, %137, %165, %193, %221, %249 in 0 : vector<2x32xf32>, vector<2x32xf32>, vector<2x32xf32>, vector<2x32xf32>, vector<2x32xf32>, vector<2x32xf32>, vector<2x32xf32>, vector<2x32xf32> -> vector<16x32xf32>
    %c0_42 = arith.constant 0 : index
    %c0_43 = arith.constant 0 : index
    %251 = vector.load %arg4[%c0_42, %c0_43] : memref<32x128xf32, #tpu.memory_space<vmem>>, vector<32x128xf32>
    %c0_44 = arith.constant 0 : index
    %c0_45 = arith.constant 0 : index
    %252 = vector.load %arg5[%c0_44, %c0_45] : memref<32x128xf32, #tpu.memory_space<vmem>>, vector<32x128xf32>
    %c0_46 = arith.constant 0 : index
    %c0_47 = arith.constant 0 : index
    %253 = vector.load %arg6[%c0_46, %c0_47] : memref<1x128xf32, #tpu.memory_space<vmem>>, vector<1x128xf32>
    %cst_48 = arith.constant dense<0.000000e+00> : vector<16x128xf32>
    %254 = tpu.matmul %250, %251, %cst_48 {dimension_numbers = #tpu.dot_dimension_numbers<[1], [0], [0], [1], [0, 0, 1, 1], [], []>} : vector<16x32xf32>, vector<32x128xf32>, vector<16x128xf32> -> vector<16x128xf32>
    %255 = vector.broadcast %253 : vector<1x128xf32> to vector<16x128xf32>
    %256 = arith.addf %254, %255 : vector<16x128xf32>
    %cst_49 = arith.constant 0.000000e+00 : f32
    %257 = vector.broadcast %cst_49 : f32 to vector<2x32xf32>
    %cst_50 = arith.constant 0.000000e+00 : f32
    %258 = vector.broadcast %cst_50 : f32 to vector<2x32xf32>
    %259 = vector.extract_strided_slice %256 {offsets = [0, 0], sizes = [2, 128], strides = [1, 1]} : vector<16x128xf32> to vector<2x128xf32>
    %cst_51 = arith.constant dense<0.000000e+00> : vector<2x128xf32>
    %260 = tpu.matmul %257, %252, %cst_51 {dimension_numbers = #tpu.dot_dimension_numbers<[1], [0], [0], [1], [0, 0, 1, 1], [], []>} : vector<2x32xf32>, vector<32x128xf32>, vector<2x128xf32> -> vector<2x128xf32>
    %261 = arith.addf %259, %260 : vector<2x128xf32>
    %262 = vector.extract_strided_slice %261 {offsets = [0, 0], sizes = [2, 32], strides = [1, 1]} : vector<2x128xf32> to vector<2x32xf32>
    %263 = arith.negf %262 : vector<2x32xf32>
    %264 = math.exp %263 : vector<2x32xf32>
    %cst_52 = arith.constant 1.000000e+00 : f32
    %265 = vector.broadcast %cst_52 : f32 to vector<2x32xf32>
    %266 = arith.addf %265, %264 : vector<2x32xf32>
    %267 = arith.divf %265, %266 : vector<2x32xf32>
    %268 = vector.extract_strided_slice %261 {offsets = [0, 32], sizes = [2, 32], strides = [1, 1]} : vector<2x128xf32> to vector<2x32xf32>
    %269 = arith.negf %268 : vector<2x32xf32>
    %270 = math.exp %269 : vector<2x32xf32>
    %cst_53 = arith.constant 1.000000e+00 : f32
    %271 = vector.broadcast %cst_53 : f32 to vector<2x32xf32>
    %272 = arith.addf %271, %270 : vector<2x32xf32>
    %273 = arith.divf %271, %272 : vector<2x32xf32>
    %274 = vector.extract_strided_slice %261 {offsets = [0, 64], sizes = [2, 32], strides = [1, 1]} : vector<2x128xf32> to vector<2x32xf32>
    %275 = math.tanh %274 : vector<2x32xf32>
    %276 = vector.extract_strided_slice %261 {offsets = [0, 96], sizes = [2, 32], strides = [1, 1]} : vector<2x128xf32> to vector<2x32xf32>
    %277 = arith.negf %276 : vector<2x32xf32>
    %278 = math.exp %277 : vector<2x32xf32>
    %cst_54 = arith.constant 1.000000e+00 : f32
    %279 = vector.broadcast %cst_54 : f32 to vector<2x32xf32>
    %280 = arith.addf %279, %278 : vector<2x32xf32>
    %281 = arith.divf %279, %280 : vector<2x32xf32>
    %282 = arith.mulf %273, %258 : vector<2x32xf32>
    %283 = arith.mulf %267, %275 : vector<2x32xf32>
    %284 = arith.addf %282, %283 : vector<2x32xf32>
    %285 = math.tanh %284 : vector<2x32xf32>
    %286 = arith.mulf %281, %285 : vector<2x32xf32>
    %287 = vector.extract_strided_slice %256 {offsets = [2, 0], sizes = [2, 128], strides = [1, 1]} : vector<16x128xf32> to vector<2x128xf32>
    %cst_55 = arith.constant dense<0.000000e+00> : vector<2x128xf32>
    %288 = tpu.matmul %286, %252, %cst_55 {dimension_numbers = #tpu.dot_dimension_numbers<[1], [0], [0], [1], [0, 0, 1, 1], [], []>} : vector<2x32xf32>, vector<32x128xf32>, vector<2x128xf32> -> vector<2x128xf32>
    %289 = arith.addf %287, %288 : vector<2x128xf32>
    %290 = vector.extract_strided_slice %289 {offsets = [0, 0], sizes = [2, 32], strides = [1, 1]} : vector<2x128xf32> to vector<2x32xf32>
    %291 = arith.negf %290 : vector<2x32xf32>
    %292 = math.exp %291 : vector<2x32xf32>
    %cst_56 = arith.constant 1.000000e+00 : f32
    %293 = vector.broadcast %cst_56 : f32 to vector<2x32xf32>
    %294 = arith.addf %293, %292 : vector<2x32xf32>
    %295 = arith.divf %293, %294 : vector<2x32xf32>
    %296 = vector.extract_strided_slice %289 {offsets = [0, 32], sizes = [2, 32], strides = [1, 1]} : vector<2x128xf32> to vector<2x32xf32>
    %297 = arith.negf %296 : vector<2x32xf32>
    %298 = math.exp %297 : vector<2x32xf32>
    %cst_57 = arith.constant 1.000000e+00 : f32
    %299 = vector.broadcast %cst_57 : f32 to vector<2x32xf32>
    %300 = arith.addf %299, %298 : vector<2x32xf32>
    %301 = arith.divf %299, %300 : vector<2x32xf32>
    %302 = vector.extract_strided_slice %289 {offsets = [0, 64], sizes = [2, 32], strides = [1, 1]} : vector<2x128xf32> to vector<2x32xf32>
    %303 = math.tanh %302 : vector<2x32xf32>
    %304 = vector.extract_strided_slice %289 {offsets = [0, 96], sizes = [2, 32], strides = [1, 1]} : vector<2x128xf32> to vector<2x32xf32>
    %305 = arith.negf %304 : vector<2x32xf32>
    %306 = math.exp %305 : vector<2x32xf32>
    %cst_58 = arith.constant 1.000000e+00 : f32
    %307 = vector.broadcast %cst_58 : f32 to vector<2x32xf32>
    %308 = arith.addf %307, %306 : vector<2x32xf32>
    %309 = arith.divf %307, %308 : vector<2x32xf32>
    %310 = arith.mulf %301, %284 : vector<2x32xf32>
    %311 = arith.mulf %295, %303 : vector<2x32xf32>
    %312 = arith.addf %310, %311 : vector<2x32xf32>
    %313 = math.tanh %312 : vector<2x32xf32>
    %314 = arith.mulf %309, %313 : vector<2x32xf32>
    %315 = vector.extract_strided_slice %256 {offsets = [4, 0], sizes = [2, 128], strides = [1, 1]} : vector<16x128xf32> to vector<2x128xf32>
    %cst_59 = arith.constant dense<0.000000e+00> : vector<2x128xf32>
    %316 = tpu.matmul %314, %252, %cst_59 {dimension_numbers = #tpu.dot_dimension_numbers<[1], [0], [0], [1], [0, 0, 1, 1], [], []>} : vector<2x32xf32>, vector<32x128xf32>, vector<2x128xf32> -> vector<2x128xf32>
    %317 = arith.addf %315, %316 : vector<2x128xf32>
    %318 = vector.extract_strided_slice %317 {offsets = [0, 0], sizes = [2, 32], strides = [1, 1]} : vector<2x128xf32> to vector<2x32xf32>
    %319 = arith.negf %318 : vector<2x32xf32>
    %320 = math.exp %319 : vector<2x32xf32>
    %cst_60 = arith.constant 1.000000e+00 : f32
    %321 = vector.broadcast %cst_60 : f32 to vector<2x32xf32>
    %322 = arith.addf %321, %320 : vector<2x32xf32>
    %323 = arith.divf %321, %322 : vector<2x32xf32>
    %324 = vector.extract_strided_slice %317 {offsets = [0, 32], sizes = [2, 32], strides = [1, 1]} : vector<2x128xf32> to vector<2x32xf32>
    %325 = arith.negf %324 : vector<2x32xf32>
    %326 = math.exp %325 : vector<2x32xf32>
    %cst_61 = arith.constant 1.000000e+00 : f32
    %327 = vector.broadcast %cst_61 : f32 to vector<2x32xf32>
    %328 = arith.addf %327, %326 : vector<2x32xf32>
    %329 = arith.divf %327, %328 : vector<2x32xf32>
    %330 = vector.extract_strided_slice %317 {offsets = [0, 64], sizes = [2, 32], strides = [1, 1]} : vector<2x128xf32> to vector<2x32xf32>
    %331 = math.tanh %330 : vector<2x32xf32>
    %332 = vector.extract_strided_slice %317 {offsets = [0, 96], sizes = [2, 32], strides = [1, 1]} : vector<2x128xf32> to vector<2x32xf32>
    %333 = arith.negf %332 : vector<2x32xf32>
    %334 = math.exp %333 : vector<2x32xf32>
    %cst_62 = arith.constant 1.000000e+00 : f32
    %335 = vector.broadcast %cst_62 : f32 to vector<2x32xf32>
    %336 = arith.addf %335, %334 : vector<2x32xf32>
    %337 = arith.divf %335, %336 : vector<2x32xf32>
    %338 = arith.mulf %329, %312 : vector<2x32xf32>
    %339 = arith.mulf %323, %331 : vector<2x32xf32>
    %340 = arith.addf %338, %339 : vector<2x32xf32>
    %341 = math.tanh %340 : vector<2x32xf32>
    %342 = arith.mulf %337, %341 : vector<2x32xf32>
    %343 = vector.extract_strided_slice %256 {offsets = [6, 0], sizes = [2, 128], strides = [1, 1]} : vector<16x128xf32> to vector<2x128xf32>
    %cst_63 = arith.constant dense<0.000000e+00> : vector<2x128xf32>
    %344 = tpu.matmul %342, %252, %cst_63 {dimension_numbers = #tpu.dot_dimension_numbers<[1], [0], [0], [1], [0, 0, 1, 1], [], []>} : vector<2x32xf32>, vector<32x128xf32>, vector<2x128xf32> -> vector<2x128xf32>
    %345 = arith.addf %343, %344 : vector<2x128xf32>
    %346 = vector.extract_strided_slice %345 {offsets = [0, 0], sizes = [2, 32], strides = [1, 1]} : vector<2x128xf32> to vector<2x32xf32>
    %347 = arith.negf %346 : vector<2x32xf32>
    %348 = math.exp %347 : vector<2x32xf32>
    %cst_64 = arith.constant 1.000000e+00 : f32
    %349 = vector.broadcast %cst_64 : f32 to vector<2x32xf32>
    %350 = arith.addf %349, %348 : vector<2x32xf32>
    %351 = arith.divf %349, %350 : vector<2x32xf32>
    %352 = vector.extract_strided_slice %345 {offsets = [0, 32], sizes = [2, 32], strides = [1, 1]} : vector<2x128xf32> to vector<2x32xf32>
    %353 = arith.negf %352 : vector<2x32xf32>
    %354 = math.exp %353 : vector<2x32xf32>
    %cst_65 = arith.constant 1.000000e+00 : f32
    %355 = vector.broadcast %cst_65 : f32 to vector<2x32xf32>
    %356 = arith.addf %355, %354 : vector<2x32xf32>
    %357 = arith.divf %355, %356 : vector<2x32xf32>
    %358 = vector.extract_strided_slice %345 {offsets = [0, 64], sizes = [2, 32], strides = [1, 1]} : vector<2x128xf32> to vector<2x32xf32>
    %359 = math.tanh %358 : vector<2x32xf32>
    %360 = vector.extract_strided_slice %345 {offsets = [0, 96], sizes = [2, 32], strides = [1, 1]} : vector<2x128xf32> to vector<2x32xf32>
    %361 = arith.negf %360 : vector<2x32xf32>
    %362 = math.exp %361 : vector<2x32xf32>
    %cst_66 = arith.constant 1.000000e+00 : f32
    %363 = vector.broadcast %cst_66 : f32 to vector<2x32xf32>
    %364 = arith.addf %363, %362 : vector<2x32xf32>
    %365 = arith.divf %363, %364 : vector<2x32xf32>
    %366 = arith.mulf %357, %340 : vector<2x32xf32>
    %367 = arith.mulf %351, %359 : vector<2x32xf32>
    %368 = arith.addf %366, %367 : vector<2x32xf32>
    %369 = math.tanh %368 : vector<2x32xf32>
    %370 = arith.mulf %365, %369 : vector<2x32xf32>
    %371 = vector.extract_strided_slice %256 {offsets = [8, 0], sizes = [2, 128], strides = [1, 1]} : vector<16x128xf32> to vector<2x128xf32>
    %cst_67 = arith.constant dense<0.000000e+00> : vector<2x128xf32>
    %372 = tpu.matmul %370, %252, %cst_67 {dimension_numbers = #tpu.dot_dimension_numbers<[1], [0], [0], [1], [0, 0, 1, 1], [], []>} : vector<2x32xf32>, vector<32x128xf32>, vector<2x128xf32> -> vector<2x128xf32>
    %373 = arith.addf %371, %372 : vector<2x128xf32>
    %374 = vector.extract_strided_slice %373 {offsets = [0, 0], sizes = [2, 32], strides = [1, 1]} : vector<2x128xf32> to vector<2x32xf32>
    %375 = arith.negf %374 : vector<2x32xf32>
    %376 = math.exp %375 : vector<2x32xf32>
    %cst_68 = arith.constant 1.000000e+00 : f32
    %377 = vector.broadcast %cst_68 : f32 to vector<2x32xf32>
    %378 = arith.addf %377, %376 : vector<2x32xf32>
    %379 = arith.divf %377, %378 : vector<2x32xf32>
    %380 = vector.extract_strided_slice %373 {offsets = [0, 32], sizes = [2, 32], strides = [1, 1]} : vector<2x128xf32> to vector<2x32xf32>
    %381 = arith.negf %380 : vector<2x32xf32>
    %382 = math.exp %381 : vector<2x32xf32>
    %cst_69 = arith.constant 1.000000e+00 : f32
    %383 = vector.broadcast %cst_69 : f32 to vector<2x32xf32>
    %384 = arith.addf %383, %382 : vector<2x32xf32>
    %385 = arith.divf %383, %384 : vector<2x32xf32>
    %386 = vector.extract_strided_slice %373 {offsets = [0, 64], sizes = [2, 32], strides = [1, 1]} : vector<2x128xf32> to vector<2x32xf32>
    %387 = math.tanh %386 : vector<2x32xf32>
    %388 = vector.extract_strided_slice %373 {offsets = [0, 96], sizes = [2, 32], strides = [1, 1]} : vector<2x128xf32> to vector<2x32xf32>
    %389 = arith.negf %388 : vector<2x32xf32>
    %390 = math.exp %389 : vector<2x32xf32>
    %cst_70 = arith.constant 1.000000e+00 : f32
    %391 = vector.broadcast %cst_70 : f32 to vector<2x32xf32>
    %392 = arith.addf %391, %390 : vector<2x32xf32>
    %393 = arith.divf %391, %392 : vector<2x32xf32>
    %394 = arith.mulf %385, %368 : vector<2x32xf32>
    %395 = arith.mulf %379, %387 : vector<2x32xf32>
    %396 = arith.addf %394, %395 : vector<2x32xf32>
    %397 = math.tanh %396 : vector<2x32xf32>
    %398 = arith.mulf %393, %397 : vector<2x32xf32>
    %399 = vector.extract_strided_slice %256 {offsets = [10, 0], sizes = [2, 128], strides = [1, 1]} : vector<16x128xf32> to vector<2x128xf32>
    %cst_71 = arith.constant dense<0.000000e+00> : vector<2x128xf32>
    %400 = tpu.matmul %398, %252, %cst_71 {dimension_numbers = #tpu.dot_dimension_numbers<[1], [0], [0], [1], [0, 0, 1, 1], [], []>} : vector<2x32xf32>, vector<32x128xf32>, vector<2x128xf32> -> vector<2x128xf32>
    %401 = arith.addf %399, %400 : vector<2x128xf32>
    %402 = vector.extract_strided_slice %401 {offsets = [0, 0], sizes = [2, 32], strides = [1, 1]} : vector<2x128xf32> to vector<2x32xf32>
    %403 = arith.negf %402 : vector<2x32xf32>
    %404 = math.exp %403 : vector<2x32xf32>
    %cst_72 = arith.constant 1.000000e+00 : f32
    %405 = vector.broadcast %cst_72 : f32 to vector<2x32xf32>
    %406 = arith.addf %405, %404 : vector<2x32xf32>
    %407 = arith.divf %405, %406 : vector<2x32xf32>
    %408 = vector.extract_strided_slice %401 {offsets = [0, 32], sizes = [2, 32], strides = [1, 1]} : vector<2x128xf32> to vector<2x32xf32>
    %409 = arith.negf %408 : vector<2x32xf32>
    %410 = math.exp %409 : vector<2x32xf32>
    %cst_73 = arith.constant 1.000000e+00 : f32
    %411 = vector.broadcast %cst_73 : f32 to vector<2x32xf32>
    %412 = arith.addf %411, %410 : vector<2x32xf32>
    %413 = arith.divf %411, %412 : vector<2x32xf32>
    %414 = vector.extract_strided_slice %401 {offsets = [0, 64], sizes = [2, 32], strides = [1, 1]} : vector<2x128xf32> to vector<2x32xf32>
    %415 = math.tanh %414 : vector<2x32xf32>
    %416 = vector.extract_strided_slice %401 {offsets = [0, 96], sizes = [2, 32], strides = [1, 1]} : vector<2x128xf32> to vector<2x32xf32>
    %417 = arith.negf %416 : vector<2x32xf32>
    %418 = math.exp %417 : vector<2x32xf32>
    %cst_74 = arith.constant 1.000000e+00 : f32
    %419 = vector.broadcast %cst_74 : f32 to vector<2x32xf32>
    %420 = arith.addf %419, %418 : vector<2x32xf32>
    %421 = arith.divf %419, %420 : vector<2x32xf32>
    %422 = arith.mulf %413, %396 : vector<2x32xf32>
    %423 = arith.mulf %407, %415 : vector<2x32xf32>
    %424 = arith.addf %422, %423 : vector<2x32xf32>
    %425 = math.tanh %424 : vector<2x32xf32>
    %426 = arith.mulf %421, %425 : vector<2x32xf32>
    %427 = vector.extract_strided_slice %256 {offsets = [12, 0], sizes = [2, 128], strides = [1, 1]} : vector<16x128xf32> to vector<2x128xf32>
    %cst_75 = arith.constant dense<0.000000e+00> : vector<2x128xf32>
    %428 = tpu.matmul %426, %252, %cst_75 {dimension_numbers = #tpu.dot_dimension_numbers<[1], [0], [0], [1], [0, 0, 1, 1], [], []>} : vector<2x32xf32>, vector<32x128xf32>, vector<2x128xf32> -> vector<2x128xf32>
    %429 = arith.addf %427, %428 : vector<2x128xf32>
    %430 = vector.extract_strided_slice %429 {offsets = [0, 0], sizes = [2, 32], strides = [1, 1]} : vector<2x128xf32> to vector<2x32xf32>
    %431 = arith.negf %430 : vector<2x32xf32>
    %432 = math.exp %431 : vector<2x32xf32>
    %cst_76 = arith.constant 1.000000e+00 : f32
    %433 = vector.broadcast %cst_76 : f32 to vector<2x32xf32>
    %434 = arith.addf %433, %432 : vector<2x32xf32>
    %435 = arith.divf %433, %434 : vector<2x32xf32>
    %436 = vector.extract_strided_slice %429 {offsets = [0, 32], sizes = [2, 32], strides = [1, 1]} : vector<2x128xf32> to vector<2x32xf32>
    %437 = arith.negf %436 : vector<2x32xf32>
    %438 = math.exp %437 : vector<2x32xf32>
    %cst_77 = arith.constant 1.000000e+00 : f32
    %439 = vector.broadcast %cst_77 : f32 to vector<2x32xf32>
    %440 = arith.addf %439, %438 : vector<2x32xf32>
    %441 = arith.divf %439, %440 : vector<2x32xf32>
    %442 = vector.extract_strided_slice %429 {offsets = [0, 64], sizes = [2, 32], strides = [1, 1]} : vector<2x128xf32> to vector<2x32xf32>
    %443 = math.tanh %442 : vector<2x32xf32>
    %444 = vector.extract_strided_slice %429 {offsets = [0, 96], sizes = [2, 32], strides = [1, 1]} : vector<2x128xf32> to vector<2x32xf32>
    %445 = arith.negf %444 : vector<2x32xf32>
    %446 = math.exp %445 : vector<2x32xf32>
    %cst_78 = arith.constant 1.000000e+00 : f32
    %447 = vector.broadcast %cst_78 : f32 to vector<2x32xf32>
    %448 = arith.addf %447, %446 : vector<2x32xf32>
    %449 = arith.divf %447, %448 : vector<2x32xf32>
    %450 = arith.mulf %441, %424 : vector<2x32xf32>
    %451 = arith.mulf %435, %443 : vector<2x32xf32>
    %452 = arith.addf %450, %451 : vector<2x32xf32>
    %453 = math.tanh %452 : vector<2x32xf32>
    %454 = arith.mulf %449, %453 : vector<2x32xf32>
    %455 = vector.extract_strided_slice %256 {offsets = [14, 0], sizes = [2, 128], strides = [1, 1]} : vector<16x128xf32> to vector<2x128xf32>
    %cst_79 = arith.constant dense<0.000000e+00> : vector<2x128xf32>
    %456 = tpu.matmul %454, %252, %cst_79 {dimension_numbers = #tpu.dot_dimension_numbers<[1], [0], [0], [1], [0, 0, 1, 1], [], []>} : vector<2x32xf32>, vector<32x128xf32>, vector<2x128xf32> -> vector<2x128xf32>
    %457 = arith.addf %455, %456 : vector<2x128xf32>
    %458 = vector.extract_strided_slice %457 {offsets = [0, 0], sizes = [2, 32], strides = [1, 1]} : vector<2x128xf32> to vector<2x32xf32>
    %459 = arith.negf %458 : vector<2x32xf32>
    %460 = math.exp %459 : vector<2x32xf32>
    %cst_80 = arith.constant 1.000000e+00 : f32
    %461 = vector.broadcast %cst_80 : f32 to vector<2x32xf32>
    %462 = arith.addf %461, %460 : vector<2x32xf32>
    %463 = arith.divf %461, %462 : vector<2x32xf32>
    %464 = vector.extract_strided_slice %457 {offsets = [0, 32], sizes = [2, 32], strides = [1, 1]} : vector<2x128xf32> to vector<2x32xf32>
    %465 = arith.negf %464 : vector<2x32xf32>
    %466 = math.exp %465 : vector<2x32xf32>
    %cst_81 = arith.constant 1.000000e+00 : f32
    %467 = vector.broadcast %cst_81 : f32 to vector<2x32xf32>
    %468 = arith.addf %467, %466 : vector<2x32xf32>
    %469 = arith.divf %467, %468 : vector<2x32xf32>
    %470 = vector.extract_strided_slice %457 {offsets = [0, 64], sizes = [2, 32], strides = [1, 1]} : vector<2x128xf32> to vector<2x32xf32>
    %471 = math.tanh %470 : vector<2x32xf32>
    %472 = vector.extract_strided_slice %457 {offsets = [0, 96], sizes = [2, 32], strides = [1, 1]} : vector<2x128xf32> to vector<2x32xf32>
    %473 = arith.negf %472 : vector<2x32xf32>
    %474 = math.exp %473 : vector<2x32xf32>
    %cst_82 = arith.constant 1.000000e+00 : f32
    %475 = vector.broadcast %cst_82 : f32 to vector<2x32xf32>
    %476 = arith.addf %475, %474 : vector<2x32xf32>
    %477 = arith.divf %475, %476 : vector<2x32xf32>
    %478 = arith.mulf %469, %452 : vector<2x32xf32>
    %479 = arith.mulf %463, %471 : vector<2x32xf32>
    %480 = arith.addf %478, %479 : vector<2x32xf32>
    %481 = math.tanh %480 : vector<2x32xf32>
    %482 = arith.mulf %477, %481 : vector<2x32xf32>
    %c0_83 = arith.constant 0 : index
    %c0_84 = arith.constant 0 : index
    %483 = vector.load %arg7[%c0_83, %c0_84] : memref<32x4xf32, #tpu.memory_space<vmem>>, vector<32x4xf32>
    %cst_85 = arith.constant dense<0.000000e+00> : vector<2x4xf32>
    %484 = tpu.matmul %482, %483, %cst_85 {dimension_numbers = #tpu.dot_dimension_numbers<[1], [0], [0], [1], [0, 0, 1, 1], [], []>} : vector<2x32xf32>, vector<32x4xf32>, vector<2x4xf32> -> vector<2x4xf32>
    %c0_86 = arith.constant 0 : index
    %c0_87 = arith.constant 0 : index
    %485 = vector.load %arg8[%c0_86, %c0_87] : memref<1x4xf32, #tpu.memory_space<vmem>>, vector<1x4xf32>
    %486 = vector.broadcast %485 : vector<1x4xf32> to vector<2x4xf32>
    %487 = arith.addf %484, %486 : vector<2x4xf32>
    %c0_88 = arith.constant 0 : index
    %c0_89 = arith.constant 0 : index
    %488 = vector.load %arg9[%c0_88, %c0_89] : memref<2x4xf32, #tpu.memory_space<vmem>>, vector<2x4xf32>
    tpu.vector_store %arg9[%c0_88, %c0_89], %487 {strides = array<i32>} : memref<2x4xf32, #tpu.memory_space<vmem>>, vector<2x4xf32>,
    return
  }
}

</mosaic_0001>

<bundles_post_ra>
// kernel: stock_lstm_forward.1
= control target key start
LH: loop header
LB: loop body
LE: loop exit
PB: predicated region body
PF: predicated region fallthrough
CT: control target
= control target key end

     0   :  { %14 = vsyncpa [#allocation3], 0  ;;  %s3082_s0 = inlined_call_operand.vmem [shape: f32[2,8,4], index: 0, kind: input, shape index: {}]   ;;  %s3083_s1 = inlined_call_operand.hbm [shape: f32[4,128], index: 1, kind: input, shape index: {}]   ;;  %s3084_s2 = inlined_call_operand.vmem [shape: f32[32,128], index: 2, kind: input, shape index: {}]   ;;  %s3085_s3 = inlined_call_operand.vmem [shape: f32[1,128], index: 3, kind: input, shape index: {}]   ;;  %s3086_s4 = inlined_call_operand.vmem [shape: f32[32,128], index: 4, kind: input, shape index: {}]   ;;  %s3087_s5 = inlined_call_operand.hbm [shape: f32[32,128], index: 5, kind: input, shape index: {}]   ;;  %s3088_s6 = inlined_call_operand.vmem [shape: f32[1,128], index: 6, kind: input, shape index: {}]   ;;  %s3089_s7 = inlined_call_operand.vmem [shape: f32[32,4], index: 7, kind: input, shape index: {}]   ;;  %s3090_s8 = inlined_call_operand.vmem [shape: f32[1,4], index: 8, kind: input, shape index: {}]   ;;  %s3091_s9 = inlined_call_operand.hbm [shape: f32[2,4], index: 9, kind: output, shape index: {}]  }
   0x1   :  { %15 = vsyncpa [#allocation6], 0 }
   0x2   :  { %16 = vsyncpa [#allocation4], 0  ;;  %s2635_s30 = smov [#allocation2]   ;;  %s2636_s11 = smov [#allocation5]  }
   0x3   :  { %s25_s10 = sshll.u32 %s2635_s30, 4  ;;  %s40_s12 = sshll.u32 %s2636_s11, 4  ;;  %s26_s10 = int_to_ptr.vmem [resolvable:$true] %s25_s10  ;;  %s41_s12 = int_to_ptr.vmem [resolvable:$true] %s40_s12 }
   0x4   :  { %s2577_s13 = scalar_lea.vmem %s26_s10, 64  ;;  %p2582_p1 = scmp.lt.s32.totalorder %s26_s10, %s26_s10 }
   0x5   :  { %p2578_p0 = scmp.ne.s32.totalorder %s26_s10, %s2577_s13  ;;  %p2583_p2 = scmp.lt.s32.totalorder %s2577_s13, %s2577_s13 }
   0x7   :  { %p2584_p3 = por %p2583_p2, %p2582_p1 }
   0x9   :  { %p2585_p4 = pnand %p2584_p3, %p2578_p0 }
   0xb   :  { %2588 = shalt.err (!%p2585_p4)
}
   0xc   :  { %28 = dma.hbm_to_vmem [thread:$0]  %s3083_s1, 64, %s26_s10, [#allocation3]  }
   0xd   :  { %s2597_s16 = scalar_lea.vmem %s41_s12, 512  ;;  %p2602_p6 = scmp.lt.s32.totalorder %s41_s12, %s41_s12 }
   0xe   :  { %p2598_p5 = scmp.ne.s32.totalorder %s41_s12, %s2597_s16  ;;  %p2603_p7 = scmp.lt.s32.totalorder %s2597_s16, %s2597_s16 }
  0x10   :  { %p2604_p8 = por %p2603_p7, %p2602_p6 }
  0x12   :  { %p2605_p9 = pnand %p2604_p8, %p2598_p5 }
  0x14   :  { %2608 = shalt.err (!%p2605_p9)
}
  0x15   :  { %s2637_s17 = smov 128   ;;  %s2638_s18 = smov 8  }
  0x16   :  { %46 = dma.hbm_to_vmem [thread:$0]  %s3087_s5, 512, %s41_s12, [#allocation6], %s2637_s17, %s2637_s17, %s2638_s18  }
  0x17   :  { %2629 = dma.done.wait [#allocation3], 64  }
  0x18   :  { %2630 = vsyncadd [#allocation3], 4294967232 }
  0x19   :  { %2631 = dma.done.wait [#allocation6], 512  }
  0x1a   :  { %2632 = vsyncadd [#allocation6], 4294966784  ;;  %v2639_v0 = vmov 0.0   ;;  %vm2640_vm0 = vmmov 0   ;;  %vm99_vm1 = vcmask 1043456   ;;  %vm64_vm2 = vcmask 1041409  }
  0x1b   :  { %2234 = vmatprep.subr.mxu1 %v2639_v0  ;;  %2242 = vmatprep.mubr.msk.f32.mxu1 %vm2640_vm0, %v2639_v0  ;;  %v2706_v1 = vld [vmem:[%s3084_s2 + $0x18] sm:$0xff]  ;;  %v2711_v2 = vld [vmem:[%s3084_s2 + $0x10] sm:$0xff]  ;;  %v106_v3 = vld [vmem:[#allocation2] sm:$0xf]  ;;  %vm69_vm3 = vcmask 1043459   ;;  %vm74_vm4 = vcmask 1045509  }
  0x1c   :  { %2235 = vmatpush3.msra.mxu1 %v2706_v1  ;;  %2229 = vmatprep.subr.msk.mxu0 %vm99_vm1, %v106_v3  ;;  %v59_v4 = vld [vmem:[%s3082_s0] sm:$0xff]  ;;  %v60_v5 = vld [vmem:[%s3082_s0 + $0x8] sm:$0xff]  ;;  %vm79_vm5 = vcmask 1047559   ;;  %vm97_vm6 = vcmask 1041408   ;;  %vm101_vm7 = vcmask 1045504   ;;  %vm118_vm8 = vcmask 31744  }
  0x1d   :  { %2236 = vmatprep.subr.mxu1 %v2639_v0  ;;  %2230 = vmatpush3.msk.msra.mxu0 %vm99_vm1, %v106_v3  ;;  %v63_v6 = vrot.slane %v60_v5, 7  ;;  %v67_v7 = vrot.slane %v59_v4, 7  ;;  %v68_v8 = vrot.slane %v60_v5, 6  ;;  %v72_v9 = vrot.slane %v59_v4, 6  ;;  %v2726_v10 = vld [vmem:[%s3084_s2 + $0x8] sm:$0xff]  ;;  %v2736_v19 = vld [vmem:[%s3084_s2] sm:$0xff] }
  0x1e   :  { %2237 = vmatpush3.msra.mxu1 %v2711_v2  ;;  %v73_v11 = vrot.slane %v60_v5, 5  ;;  %v77_v12 = vrot.slane %v59_v4, 5  ;;  %v78_v13 = vrot.slane %v60_v5, 4  ;;  %v82_v14 = vrot.slane %v59_v4, 4  ;;  %2245 = vmatprep.subr.mxu0 %v2639_v0  ;;  %v2096_v37 = vld [vmem:[%s3085_s3] ss:$0 sm:$0xff] }
  0x1f   :  { %2238 = vmatprep.subr.mxu1 %v2639_v0  ;;  %v65_v15 = vsel %vm64_vm2, %v63_v6, %v59_v4  ;;  %v70_v16 = vsel %vm69_vm3, %v68_v8, %v67_v7  ;;  %v83_v17 = vrot.slane %v60_v5, 3  ;;  %v86_v18 = vrot.slane %v59_v4, 3  ;;  %s2641_s10 = smov 64   ;;  %s2642_s3 = smov 32  }
  0x20   :  { %v75_v20 = vsel %vm74_vm4, %v73_v11, %v72_v9  ;;  %v80_v21 = vsel %vm79_vm5, %v78_v13, %v77_v12  ;;  %v98_v22 = vsel %vm97_vm6, %v65_v15, %v70_v16  ;;  %2239 = vmatpush3.msra.mxu1 %v2726_v10  ;;  %v87_v23 = vrot.slane %v60_v5, 2 }
  0x21   :  { %v100_v24 = vsel %vm99_vm1, %v98_v22, %v75_v20  ;;  %v84_v25 = vsel %vm64_vm2, %v83_v17, %v82_v14  ;;  %v90_v26 = vrot.slane %v59_v4, 2  ;;  %v91_v27 = vrot.slane %v60_v5, 1  ;;  %2240 = vmatprep.subr.mxu1 %v2639_v0 }
  0x22   :  { %v102_v28 = vsel %vm101_vm7, %v100_v24, %v80_v21  ;;  %v88_v29 = vsel %vm69_vm3, %v87_v23, %v86_v18  ;;  %v94_v30 = vrot.slane %v59_v4, 1  ;;  %2241 = vmatpush3.msra.mxu1 %v2736_v19  ;;  %vm203_vm9 = vcmask 261120  }
  0x23   :  { %2231 = vmatprep.mubr.msk.f32.mxu0 %vm118_vm8, %v102_v28  ;;  %v92_v31 = vsel %vm74_vm4, %v91_v27, %v90_v26  ;;  %v103_v32 = vsel %vm97_vm6, %v84_v25, %v88_v29  ;;  %2243 = vmatmul.mubr.f32.vlgmr.msra.gmra.mxu1 %v2639_v0  ;;  %vm2078_vm10 = vcmask 25600  }
  0x24   :  { %v95_v33 = vsel %vm79_vm5, %v60_v5, %v94_v30  ;;  %v104_v34 = vsel %vm99_vm1, %v103_v32, %v92_v31  ;;  %2256 = vmatprep.subr.mxu1 %v2639_v0  ;;  %2264 = vmatprep.mubr.msk.f32.mxu1 %vm2640_vm0, %v2639_v0 }
  0x25   :  { %v105_v35 = vsel %vm101_vm7, %v104_v34, %v95_v33  ;;  %2257 = vmatpush3.msra.mxu1 %v2706_v1 }
  0x26   :  { %2232 = vmatmul.mubr.msk.f32.vlgmr.msra.gmra.mxu0 %vm118_vm8, %v105_v35  ;;  %2258 = vmatprep.subr.mxu1 %v2639_v0 }
  0x27   :  { %2246 = vmatpush3.msra.mxu0 %v2706_v1  ;;  %2253 = vmatprep.mubr.msk.f32.mxu0 %vm2640_vm0, %v2639_v0 }
  0x28   :  { %2247 = vmatprep.subr.mxu0 %v2639_v0  ;;  %2259 = vmatpush3.msra.mxu1 %v2711_v2 }
  0x29   :  { %2248 = vmatpush3.msra.mxu0 %v2711_v2  ;;  %2260 = vmatprep.subr.mxu1 %v2639_v0 }
  0x2a   :  { %2249 = vmatprep.subr.mxu0 %v2639_v0  ;;  %2261 = vmatpush3.msra.mxu1 %v2726_v10 }
  0x2b   :  { %2250 = vmatpush3.msra.mxu0 %v2726_v10  ;;  %2262 = vmatprep.subr.mxu1 %v2639_v0 }
  0x2c   :  { %2251 = vmatprep.subr.mxu0 %v2639_v0  ;;  %2263 = vmatpush3.msra.mxu1 %v2736_v19 }
  0x2d   :  { %2252 = vmatpush3.msra.mxu0 %v2736_v19  ;;  %2278 = vmatprep.subr.mxu1 %v2639_v0 }
  0x2e   :  { %2267 = vmatprep.subr.mxu0 %v2639_v0 }
  0xe3   :  { %v273_v36 = vpop.f32.mrf.mxu1 }
  0xe5   :  { %v2244_v38 = vpop.f32.mrf.mxu1 }
  0xe6   :  { %v2233_v39 = vpop.f32.mrf.mxu0 }
  0xe7   :  { %v2780_v40 = vadd.f32 %v2233_v39, %v2096_v37 }
  0xe8   :  { %v194_v41 = vpop.f32.mrf.mxu0 }
  0xe9   :  { %v2782_v42 = vadd.f32 %v2096_v37, %v194_v41 }
  0xeb   :  { %v277_v43 = vadd.f32 %v273_v36, %v2782_v42 }
  0xed   :  { %2441 = vtanh.f32 %v277_v43  ;;  %v2100_v45 = vmul.f32 -1.442695, %v277_v43 }
  0xef   :  { %2443 = vpow2.f32 %v2100_v45 }
  0xfa   :  { %v2442_v44 = vpop.eup %2441 }
  0xfb   :  { %287 = vrot.lane.b32.xlu0 %v2442_v44, %s2641_s10 }
  0xfc   :  { %v2444_v46 = vpop.eup %2443 }
  0xfd   :  { %v281_v47 = vadd.f32 1.0, %v2444_v46 }
  0xff   :  { %2445 = vrcp.f32 %v281_v47 }
 0x10c   :  { %v2446_v48 = vpop.eup %2445 }
 0x10d   :  { %v285_v51 = vmul.f32 0.0, %v2446_v48 }
 0x16d   :  { %v288_v49 = vpop.permute.xlu0 %287 }
 0x16e   :  { %v290_v50 = vmul.f32 %v2446_v48, %v288_v49 }
 0x170   :  { %292 = vrot.lane.b32.xlu0 %v290_v50, %s2642_s3 }
 0x1e2   :  { %v293_v52 = vpop.permute.xlu0 %292 }
 0x1e3   :  { %v295_v53 = vadd.f32 %v293_v52, %v285_v51 }
 0x1e5   :  { %2447 = vtanh.f32 %v295_v53  ;;  %v389_v8 = vrot.slane %v295_v53, 6 }
 0x1f2   :  { %v2448_v54 = vpop.eup %2447 }
 0x1f3   :  { %298 = vrot.lane.b32.xlu1 %v2448_v54, %s2641_s10 }
 0x265   :  { %v299_v55 = vpop.permute.xlu1 %298 }
 0x266   :  { %v2788_v56 = vmul.f32 %v2446_v48, %v299_v55 }
 0x268   :  { %303 = vrot.lane.b32.xlu1 %v2788_v56, %s2642_s3 }
 0x2da   :  { %v304_v57 = vpop.permute.xlu1 %303 }
 0x2db   :  { %2254 = vmatmul.mubr.msk.f32.vlgmr.msra.gmra.mxu0 %vm203_vm9, %v304_v57 }
 0x2dc   :  { %2268 = vmatpush3.msra.mxu0 %v2706_v1  ;;  %2275 = vmatprep.mubr.msk.f32.mxu0 %vm2640_vm0, %v2639_v0 }
 0x2dd   :  { %2269 = vmatprep.subr.mxu0 %v2639_v0 }
 0x2de   :  { %2270 = vmatpush3.msra.mxu0 %v2711_v2 }
 0x2df   :  { %2271 = vmatprep.subr.mxu0 %v2639_v0 }
 0x2e0   :  { %2272 = vmatpush3.msra.mxu0 %v2726_v10 }
 0x2e1   :  { %2273 = vmatprep.subr.mxu0 %v2639_v0 }
 0x2e2   :  { %2274 = vmatpush3.msra.mxu0 %v2736_v19 }
 0x2e3   :  { %2289 = vmatprep.subr.mxu0 %v2639_v0 }
 0x39b   :  { %v373_v58 = vpop.f32.mrf.mxu0 }
 0x39c   :  { %v378_v59 = vrot.slane %v373_v58, 6 }
 0x39d   :  { %v2255_v60 = vpop.f32.mrf.mxu0 }
 0x39e   :  { %v380_v61 = vadd.f32 %v378_v59, %v2782_v42 }
 0x3a0   :  { %2449 = vtanh.f32 %v380_v61  ;;  %v2102_v63 = vmul.f32 -1.442695, %v380_v61 }
 0x3a2   :  { %2451 = vpow2.f32 %v2102_v63 }
 0x3ad   :  { %v2450_v62 = vpop.eup %2449 }
 0x3ae   :  { %393 = vrot.lane.b32.xlu0 %v2450_v62, %s2641_s10 }
 0x3af   :  { %v2452_v3 = vpop.eup %2451 }
 0x3b0   :  { %v384_v4 = vadd.f32 1.0, %v2452_v3 }
 0x3b2   :  { %2453 = vrcp.f32 %v384_v4 }
 0x3bf   :  { %v2454_v5 = vpop.eup %2453 }
 0x3c0   :  { %v391_v9 = vmul.f32 %v2454_v5, %v389_v8 }
 0x420   :  { %v394_v6 = vpop.permute.xlu0 %393 }
 0x421   :  { %v396_v7 = vmul.f32 %v2454_v5, %v394_v6 }
 0x423   :  { %398 = vrot.lane.b32.xlu1 %v396_v7, %s2642_s3 }
 0x495   :  { %v399_v11 = vpop.permute.xlu1 %398 }
 0x496   :  { %v401_v12 = vadd.f32 %v399_v11, %v391_v9 }
 0x498   :  { %2455 = vtanh.f32 %v401_v12  ;;  %v496_v30 = vrot.slane %v401_v12, 6 }
 0x4a5   :  { %v2456_v13 = vpop.eup %2455 }
 0x4a6   :  { %404 = vrot.lane.b32.xlu0 %v2456_v13, %s2641_s10 }
 0x518   :  { %v405_v14 = vpop.permute.xlu0 %404 }
 0x519   :  { %v407_v15 = vmul.f32 %v2454_v5, %v405_v14 }
 0x51b   :  { %v409_v16 = vrot.slane %v407_v15, 2  ;;  %v1046_v37 = vsel %vm97_vm6, %v2788_v56, %v407_v15 }
 0x51d   :  { %410 = vrot.lane.b32.xlu1 %v409_v16, %s2642_s3 }
 0x58f   :  { %v411_v17 = vpop.permute.xlu1 %410 }
 0x590   :  { %2265 = vmatmul.mubr.msk.f32.vlgmr.msra.gmra.mxu1 %vm203_vm9, %v411_v17 }
 0x591   :  { %2279 = vmatpush3.msra.mxu1 %v2706_v1  ;;  %2286 = vmatprep.mubr.msk.f32.mxu1 %vm2640_vm0, %v2639_v0 }
 0x592   :  { %2280 = vmatprep.subr.mxu1 %v2639_v0 }
 0x593   :  { %2281 = vmatpush3.msra.mxu1 %v2711_v2 }
 0x594   :  { %2282 = vmatprep.subr.mxu1 %v2639_v0 }
 0x595   :  { %2283 = vmatpush3.msra.mxu1 %v2726_v10 }
 0x596   :  { %2284 = vmatprep.subr.mxu1 %v2639_v0 }
 0x597   :  { %2285 = vmatpush3.msra.mxu1 %v2736_v19 }
 0x598   :  { %2300 = vmatprep.subr.mxu1 %v2639_v0 }
 0x650   :  { %v480_v18 = vpop.f32.mrf.mxu1 }
 0x651   :  { %v485_v20 = vrot.slane %v480_v18, 4 }
 0x652   :  { %v2266_v21 = vpop.f32.mrf.mxu1 }
 0x653   :  { %v487_v22 = vadd.f32 %v485_v20, %v2782_v42 }
 0x655   :  { %2457 = vtanh.f32 %v487_v22  ;;  %v2104_v24 = vmul.f32 -1.442695, %v487_v22 }
 0x657   :  { %2459 = vpow2.f32 %v2104_v24 }
 0x662   :  { %v2458_v23 = vpop.eup %2457 }
 0x663   :  { %500 = vrot.lane.b32.xlu0 %v2458_v23, %s2641_s10 }
 0x664   :  { %v2460_v25 = vpop.eup %2459 }
 0x665   :  { %v491_v26 = vadd.f32 1.0, %v2460_v25 }
 0x667   :  { %2461 = vrcp.f32 %v491_v26 }
 0x674   :  { %v2462_v27 = vpop.eup %2461 }
 0x675   :  { %v498_v31 = vmul.f32 %v2462_v27, %v496_v30 }
 0x6d5   :  { %v501_v28 = vpop.permute.xlu0 %500 }
 0x6d6   :  { %v503_v29 = vmul.f32 %v2462_v27, %v501_v28 }
 0x6d8   :  { %505 = vrot.lane.b32.xlu1 %v503_v29, %s2642_s3 }
 0x74a   :  { %v506_v32 = vpop.permute.xlu1 %505 }
 0x74b   :  { %v508_v33 = vadd.f32 %v506_v32, %v498_v31 }
 0x74d   :  { %2463 = vtanh.f32 %v508_v33  ;;  %v603_v54 = vrot.slane %v508_v33, 6 }
 0x75a   :  { %v2464_v34 = vpop.eup %2463 }
 0x75b   :  { %511 = vrot.lane.b32.xlu0 %v2464_v34, %s2641_s10 }
 0x7cd   :  { %v512_v35 = vpop.permute.xlu0 %511 }
 0x7ce   :  { %v514_v36 = vmul.f32 %v2462_v27, %v512_v35 }
 0x7d0   :  { %v516_v38 = vrot.slane %v514_v36, 4  ;;  %v1047_v39 = vsel %vm99_vm1, %v1046_v37, %v514_v36 }
 0x7d2   :  { %517 = vrot.lane.b32.xlu1 %v516_v38, %s2642_s3 }
 0x844   :  { %v518_v41 = vpop.permute.xlu1 %517 }
 0x845   :  { %2276 = vmatmul.mubr.msk.f32.vlgmr.msra.gmra.mxu0 %vm203_vm9, %v518_v41 }
 0x846   :  { %2290 = vmatpush3.msra.mxu0 %v2706_v1  ;;  %2297 = vmatprep.mubr.msk.f32.mxu0 %vm2640_vm0, %v2639_v0 }
 0x847   :  { %2291 = vmatprep.subr.mxu0 %v2639_v0 }
 0x848   :  { %2292 = vmatpush3.msra.mxu0 %v2711_v2 }
 0x849   :  { %2293 = vmatprep.subr.mxu0 %v2639_v0 }
 0x84a   :  { %2294 = vmatpush3.msra.mxu0 %v2726_v10 }
 0x84b   :  { %2295 = vmatprep.subr.mxu0 %v2639_v0 }
 0x84c   :  { %2296 = vmatpush3.msra.mxu0 %v2736_v19 }
 0x84d   :  { %2311 = vmatprep.subr.mxu0 %v2639_v0 }
 0x905   :  { %v587_v43 = vpop.f32.mrf.mxu0 }
 0x906   :  { %v592_v44 = vrot.slane %v587_v43, 2 }
 0x907   :  { %v2277_v45 = vpop.f32.mrf.mxu0 }
 0x908   :  { %v594_v46 = vadd.f32 %v592_v44, %v2782_v42 }
 0x90a   :  { %2465 = vtanh.f32 %v594_v46  ;;  %v2106_v48 = vmul.f32 -1.442695, %v594_v46 }
 0x90c   :  { %2467 = vpow2.f32 %v2106_v48 }
 0x917   :  { %v2466_v47 = vpop.eup %2465 }
 0x918   :  { %607 = vrot.lane.b32.xlu0 %v2466_v47, %s2641_s10 }
 0x919   :  { %v2468_v49 = vpop.eup %2467 }
 0x91a   :  { %v598_v50 = vadd.f32 1.0, %v2468_v49 }
 0x91c   :  { %2469 = vrcp.f32 %v598_v50 }
 0x929   :  { %v2470_v51 = vpop.eup %2469 }
 0x92a   :  { %v605_v55 = vmul.f32 %v2470_v51, %v603_v54 }
 0x98a   :  { %v608_v52 = vpop.permute.xlu0 %607 }
 0x98b   :  { %v610_v53 = vmul.f32 %v2470_v51, %v608_v52 }
 0x98d   :  { %612 = vrot.lane.b32.xlu1 %v610_v53, %s2642_s3 }
 0x9ff   :  { %v613_v56 = vpop.permute.xlu1 %612 }
 0xa00   :  { %v615_v57 = vadd.f32 %v613_v56, %v605_v55 }
 0xa02   :  { %2471 = vtanh.f32 %v615_v57  ;;  %v707_v13 = vrot.slane %v615_v57, 6 }
 0xa0f   :  { %v2472_v42 = vpop.eup %2471 }
 0xa10   :  { %618 = vrot.lane.b32.xlu0 %v2472_v42, %s2641_s10 }
 0xa82   :  { %v619_v58 = vpop.permute.xlu0 %618 }
 0xa83   :  { %v621_v59 = vmul.f32 %v2470_v51, %v619_v58 }
 0xa85   :  { %v623_v60 = vrot.slane %v621_v59, 6  ;;  %v2843_v61 = vsel %vm101_vm7, %v1047_v39, %v621_v59 }
 0xa87   :  { %624 = vrot.lane.b32.xlu1 %v623_v60, %s2642_s3 }
 0xaf9   :  { %v625_v62 = vpop.permute.xlu1 %624 }
 0xafa   :  { %2287 = vmatmul.mubr.msk.f32.vlgmr.msra.gmra.mxu1 %vm203_vm9, %v625_v62 }
 0xafb   :  { %2301 = vmatpush3.msra.mxu1 %v2706_v1  ;;  %2308 = vmatprep.mubr.msk.f32.mxu1 %vm2640_vm0, %v2639_v0 }
 0xafc   :  { %2302 = vmatprep.subr.mxu1 %v2639_v0 }
 0xafd   :  { %2303 = vmatpush3.msra.mxu1 %v2711_v2 }
 0xafe   :  { %2304 = vmatprep.subr.mxu1 %v2639_v0 }
 0xaff   :  { %2305 = vmatpush3.msra.mxu1 %v2726_v10 }
 0xb00   :  { %2306 = vmatprep.subr.mxu1 %v2639_v0 }
 0xb01   :  { %2307 = vmatpush3.msra.mxu1 %v2736_v19 }
 0xbba   :  { %v694_v63 = vpop.f32.mrf.mxu1 }
 0xbbb   :  { %v698_v3 = vadd.f32 %v694_v63, %v2780_v40 }
 0xbbc   :  { %v2288_v4 = vpop.f32.mrf.mxu1 }
 0xbbd   :  { %2473 = vtanh.f32 %v698_v3  ;;  %v2108_v6 = vmul.f32 -1.442695, %v698_v3 }
 0xbbf   :  { %2475 = vpow2.f32 %v2108_v6 }
 0xbca   :  { %v2474_v5 = vpop.eup %2473 }
 0xbcb   :  { %711 = vrot.lane.b32.xlu0 %v2474_v5, %s2641_s10 }
 0xbcc   :  { %v2476_v7 = vpop.eup %2475 }
 0xbcd   :  { %v702_v8 = vadd.f32 1.0, %v2476_v7 }
 0xbcf   :  { %2477 = vrcp.f32 %v702_v8 }
 0xbdc   :  { %v2478_v9 = vpop.eup %2477 }
 0xbdd   :  { %v709_v14 = vmul.f32 %v2478_v9, %v707_v13 }
 0xc3d   :  { %v712_v11 = vpop.permute.xlu0 %711 }
 0xc3e   :  { %v714_v12 = vmul.f32 %v2478_v9, %v712_v11 }
 0xc40   :  { %716 = vrot.lane.b32.xlu1 %v714_v12, %s2642_s3 }
 0xcb2   :  { %v717_v15 = vpop.permute.xlu1 %716 }
 0xcb3   :  { %v719_v16 = vadd.f32 %v717_v15, %v709_v14 }
 0xcb5   :  { %2479 = vtanh.f32 %v719_v16 }
 0xcc2   :  { %v2480_v17 = vpop.eup %2479 }
 0xcc3   :  { %722 = vrot.lane.b32.xlu0 %v2480_v17, %s2641_s10  ;;  %v1055_v17 = vld [vmem:[%s3086_s4 + $0x18] sm:$0xff] }
 0xcc4   :  { %2322 = vmatprep.subr.mxu1 %v1055_v17 }
 0xd35   :  { %v723_v18 = vpop.permute.xlu0 %722 }
 0xd36   :  { %v2860_v20 = vmul.f32 %v2478_v9, %v723_v18  ;;  %v1054_v18 = vld [vmem:[%s3086_s4 + $0x10] sm:$0xff] }
 0xd38   :  { %727 = vrot.lane.b32.xlu1 %v2860_v20, %s2642_s3 }
 0xdaa   :  { %v728_v21 = vpop.permute.xlu1 %727 }
 0xdab   :  { %2298 = vmatmul.mubr.msk.f32.vlgmr.msra.gmra.mxu0 %vm203_vm9, %v728_v21  ;;  %v1053_v21 = vld [vmem:[%s3086_s4 + $0x8] sm:$0xff] }
 0xdac   :  { %2312 = vmatpush3.msra.mxu0 %v2706_v1  ;;  %2319 = vmatprep.mubr.msk.f32.mxu0 %vm2640_vm0, %v2639_v0 }
 0xdad   :  { %2313 = vmatprep.subr.mxu0 %v2639_v0 }
 0xdae   :  { %2314 = vmatpush3.msra.mxu0 %v2711_v2 }
 0xdaf   :  { %2315 = vmatprep.subr.mxu0 %v2639_v0 }
 0xdb0   :  { %2316 = vmatpush3.msra.mxu0 %v2726_v10 }
 0xdb1   :  { %2317 = vmatprep.subr.mxu0 %v2639_v0 }
 0xdb2   :  { %2318 = vmatpush3.msra.mxu0 %v2736_v19  ;;  %v813_v19 = vrot.slane %v719_v16, 6 }
 0xdb3   :  { %2333 = vmatprep.subr.mxu0 %v2639_v0 }
 0xe6b   :  { %v797_v22 = vpop.f32.mrf.mxu0 }
 0xe6c   :  { %v802_v23 = vrot.slane %v797_v22, 6  ;;  %v2915_v22 = vld [vmem:[#allocation5 + $0x8] sm:$0xff] }
 0xe6d   :  { %v2299_v1 = vpop.f32.mrf.mxu0 }
 0xe6e   :  { %v804_v24 = vadd.f32 %v802_v23, %v2780_v40  ;;  %v1052_v23 = vld [vmem:[%s3086_s4] sm:$0xff] }
 0xe70   :  { %2481 = vtanh.f32 %v804_v24  ;;  %v2110_v2 = vmul.f32 -1.442695, %v804_v24  ;;  %v2926_v24 = vld [vmem:[#allocation5] sm:$0xff] }
 0xe72   :  { %2483 = vpow2.f32 %v2110_v2 }
 0xe7d   :  { %v2482_v25 = vpop.eup %2481 }
 0xe7e   :  { %817 = vrot.lane.b32.xlu0 %v2482_v25, %s2641_s10 }
 0xe7f   :  { %v2484_v26 = vpop.eup %2483 }
 0xe80   :  { %v808_v27 = vadd.f32 1.0, %v2484_v26 }
 0xe82   :  { %2485 = vrcp.f32 %v808_v27 }
 0xe8f   :  { %v2486_v10 = vpop.eup %2485 }
 0xe90   :  { %v815_v30 = vmul.f32 %v2486_v10, %v813_v19 }
 0xef0   :  { %v818_v28 = vpop.permute.xlu0 %817 }
 0xef1   :  { %v820_v29 = vmul.f32 %v2486_v10, %v818_v28 }
 0xef3   :  { %822 = vrot.lane.b32.xlu1 %v820_v29, %s2642_s3  ;;  %v2115_v29 = vld [vmem:[%s3088_s6] ss:$0 sm:$0xff] }
 0xf65   :  { %v823_v31 = vpop.permute.xlu1 %822 }
 0xf66   :  { %v825_v32 = vadd.f32 %v823_v31, %v815_v30 }
 0xf68   :  { %2487 = vtanh.f32 %v825_v32  ;;  %v920_v51 = vrot.slane %v825_v32, 6 }
 0xf75   :  { %v2488_v33 = vpop.eup %2487 }
 0xf76   :  { %828 = vrot.lane.b32.xlu0 %v2488_v33, %s2641_s10 }
 0xfe8   :  { %v829_v34 = vpop.permute.xlu0 %828 }
 0xfe9   :  { %v831_v35 = vmul.f32 %v2486_v10, %v829_v34 }
 0xfeb   :  { %v833_v36 = vrot.slane %v831_v35, 2  ;;  %v1049_v42 = vsel %vm97_vm6, %v2860_v20, %v831_v35  ;;  %v2906_v20 = vld [vmem:[#allocation5 + $0x18] sm:$0xff] }
 0xfed   :  { %834 = vrot.lane.b32.xlu1 %v833_v36, %s2642_s3 }
0x105f   :  { %v835_v37 = vpop.permute.xlu1 %834 }
0x1060   :  { %2309 = vmatmul.mubr.msk.f32.vlgmr.msra.gmra.mxu1 %vm203_vm9, %v835_v37 }
0x1061   :  { %2323 = vmatpush3.msra.mxu1 %v1055_v17 }
0x1062   :  { %2324 = vmatprep.subr.mxu1 %v1054_v18 }
0x1063   :  { %2325 = vmatpush3.msra.mxu1 %v1054_v18 }
0x1064   :  { %2326 = vmatprep.subr.mxu1 %v1053_v21 }
0x1065   :  { %2327 = vmatpush3.msra.mxu1 %v1053_v21 }
0x1066   :  { %2328 = vmatprep.subr.mxu1 %v1052_v23 }
0x1067   :  { %2329 = vmatpush3.msra.mxu1 %v1052_v23 }
0x1068   :  { %2344 = vmatprep.subr.mxu1 %v2639_v0 }
0x1120   :  { %v904_v38 = vpop.f32.mrf.mxu1 }
0x1121   :  { %v909_v39 = vrot.slane %v904_v38, 4 }
0x1122   :  { %v2310_v41 = vpop.f32.mrf.mxu1 }
0x1123   :  { %v911_v43 = vadd.f32 %v909_v39, %v2780_v40 }
0x1125   :  { %2489 = vtanh.f32 %v911_v43  ;;  %v2112_v45 = vmul.f32 -1.442695, %v911_v43 }
0x1127   :  { %2491 = vpow2.f32 %v2112_v45 }
0x1132   :  { %v2490_v44 = vpop.eup %2489 }
0x1133   :  { %924 = vrot.lane.b32.xlu0 %v2490_v44, %s2641_s10 }
0x1134   :  { %v2492_v46 = vpop.eup %2491 }
0x1135   :  { %v915_v47 = vadd.f32 1.0, %v2492_v46 }
0x1137   :  { %2493 = vrcp.f32 %v915_v47 }
0x1144   :  { %v2494_v48 = vpop.eup %2493 }
0x1145   :  { %v922_v52 = vmul.f32 %v2494_v48, %v920_v51 }
0x11a5   :  { %v925_v49 = vpop.permute.xlu0 %924 }
0x11a6   :  { %v927_v50 = vmul.f32 %v2494_v48, %v925_v49 }
0x11a8   :  { %929 = vrot.lane.b32.xlu1 %v927_v50, %s2642_s3 }
0x121a   :  { %v930_v53 = vpop.permute.xlu1 %929 }
0x121b   :  { %v932_v54 = vadd.f32 %v930_v53, %v922_v52 }
0x121d   :  { %2495 = vtanh.f32 %v932_v54  ;;  %v1027_v13 = vrot.slane %v932_v54, 6 }
0x122a   :  { %v2496_v55 = vpop.eup %2495 }
0x122b   :  { %935 = vrot.lane.b32.xlu0 %v2496_v55, %s2641_s10 }
0x129d   :  { %v936_v56 = vpop.permute.xlu0 %935 }
0x129e   :  { %v938_v57 = vmul.f32 %v2494_v48, %v936_v56 }
0x12a0   :  { %v940_v58 = vrot.slane %v938_v57, 4  ;;  %v2888_v59 = vsel %vm99_vm1, %v1049_v42, %v938_v57 }
0x12a2   :  { %941 = vrot.lane.b32.xlu1 %v940_v58, %s2642_s3 }
0x1314   :  { %v942_v60 = vpop.permute.xlu1 %941 }
0x1315   :  { %2320 = vmatmul.mubr.msk.f32.vlgmr.msra.gmra.mxu0 %vm203_vm9, %v942_v60 }
0x1316   :  { %2341 = vmatprep.mubr.msk.f32.mxu0 %vm2640_vm0, %v2639_v0  ;;  %2334 = vmatpush3.msra.mxu0 %v2906_v20 }
0x1317   :  { %2335 = vmatprep.subr.mxu0 %v2639_v0 }
0x13d5   :  { %v1011_v62 = vpop.f32.mrf.mxu0 }
0x13d6   :  { %v1016_v63 = vrot.slane %v1011_v62, 2 }
0x13d7   :  { %v2321_v3 = vpop.f32.mrf.mxu0 }
0x13d8   :  { %v1018_v4 = vadd.f32 %v1016_v63, %v2780_v40 }
0x13da   :  { %2497 = vtanh.f32 %v1018_v4  ;;  %v2114_v6 = vmul.f32 -1.442695, %v1018_v4 }
0x13dc   :  { %2499 = vpow2.f32 %v2114_v6 }
0x13e7   :  { %v2498_v5 = vpop.eup %2497 }
0x13e8   :  { %1031 = vrot.lane.b32.xlu0 %v2498_v5, %s2641_s10 }
0x13e9   :  { %v2500_v7 = vpop.eup %2499 }
0x13ea   :  { %v1022_v8 = vadd.f32 1.0, %v2500_v7 }
0x13ec   :  { %2501 = vrcp.f32 %v1022_v8 }
0x13f9   :  { %v2502_v9 = vpop.eup %2501 }
0x13fa   :  { %v1029_v14 = vmul.f32 %v2502_v9, %v1027_v13 }
0x145a   :  { %v1032_v11 = vpop.permute.xlu0 %1031 }
0x145b   :  { %v1034_v12 = vmul.f32 %v2502_v9, %v1032_v11 }
0x145d   :  { %1036 = vrot.lane.b32.xlu1 %v1034_v12, %s2642_s3 }
0x1461   :  { %1069 = vrot.lane.b32.xlu1 %v2843_v61, %s2642_s3  ;;  %v2909_v61 = vld [vmem:[#allocation5 + $0x10] sm:$0xff] }
0x1462   :  { %2336 = vmatpush3.msra.mxu0 %v2909_v61 }
0x1463   :  { %2337 = vmatprep.subr.mxu0 %v2639_v0 }
0x1464   :  { %2338 = vmatpush3.msra.mxu0 %v2915_v22 }
0x1465   :  { %2339 = vmatprep.subr.mxu0 %v2639_v0 }
0x1466   :  { %2340 = vmatpush3.msra.mxu0 %v2926_v24 }
0x1467   :  { %2342 = vmatmul.mubr.f32.vlgmr.msra.gmra.mxu0 %v2639_v0  ;;  %2355 = vmatprep.subr.mxu0 %v2639_v0 }
0x1468   :  { %2356 = vmatpush3.msra.mxu0 %v2906_v20  ;;  %2363 = vmatprep.mubr.msk.f32.mxu0 %vm2640_vm0, %v2639_v0 }
0x1469   :  { %2357 = vmatprep.subr.mxu0 %v2639_v0 }
0x146a   :  { %2358 = vmatpush3.msra.mxu0 %v2909_v61 }
0x146b   :  { %2359 = vmatprep.subr.mxu0 %v2639_v0 }
0x146c   :  { %2360 = vmatpush3.msra.mxu0 %v2915_v22 }
0x146d   :  { %2361 = vmatprep.subr.mxu0 %v2639_v0 }
0x146e   :  { %2362 = vmatpush3.msra.mxu0 %v2926_v24 }
0x146f   :  { %2377 = vmatprep.subr.mxu0 %v2639_v0 }
0x14cf   :  { %v1037_v40 = vpop.permute.xlu1 %1036 }
0x14d0   :  { %v1039_v15 = vadd.f32 %v1037_v40, %v1029_v14 }
0x14d2   :  { %2503 = vtanh.f32 %v1039_v15 }
0x14d3   :  { %v1070_v16 = vpop.permute.xlu1 %1069 }
0x14d4   :  { %2330 = vmatprep.mubr.msk.f32.mxu1 %vm203_vm9, %v1070_v16 }
0x14df   :  { %v2504_v1 = vpop.eup %2503 }
0x14e0   :  { %1042 = vrot.lane.b32.xlu0 %v2504_v1, %s2641_s10 }
0x1527   :  { %v1218_v10 = vpop.f32.mrf.mxu0 }
0x1529   :  { %v2343_v28 = vpop.f32.mrf.mxu0 }
0x1552   :  { %v1043_v25 = vpop.permute.xlu0 %1042 }
0x1553   :  { %v1045_v2 = vmul.f32 %v2502_v9, %v1043_v25 }
0x1555   :  { %v1051_v26 = vsel %vm101_vm7, %v2888_v59, %v1045_v2 }
0x1556   :  { %1071 = vrot.lane.b32.xlu0 %v1051_v26, %s2642_s3 }
0x15c8   :  { %v1072_v27 = vpop.permute.xlu0 %1071 }
0x15c9   :  { %2331 = vmatmul.mubr.msk.f32.vlgmr.msra.gmra.mxu1 %vm203_vm9, %v1072_v27 }
0x15ca   :  { %2345 = vmatpush3.msra.mxu1 %v2906_v20  ;;  %2352 = vmatprep.mubr.msk.f32.mxu1 %vm2640_vm0, %v2639_v0 }
0x15cb   :  { %2346 = vmatprep.subr.mxu1 %v2639_v0 }
0x15cc   :  { %2347 = vmatpush3.msra.mxu1 %v2909_v61 }
0x15cd   :  { %2348 = vmatprep.subr.mxu1 %v2639_v0 }
0x15ce   :  { %2349 = vmatpush3.msra.mxu1 %v2915_v22 }
0x15cf   :  { %2350 = vmatprep.subr.mxu1 %v2639_v0 }
0x15d0   :  { %2351 = vmatpush3.msra.mxu1 %v2926_v24 }
0x15d1   :  { %2366 = vmatprep.subr.mxu1 %v2639_v0 }
0x1689   :  { %v2332_v19 = vpop.f32.mrf.mxu1 }
0x168a   :  { %v2958_v30 = vadd.f32 %v2332_v19, %v2115_v29 }
0x168b   :  { %v1143_v31 = vpop.f32.mrf.mxu1 }
0x168c   :  { %v2960_v32 = vadd.f32 %v2115_v29, %v1143_v31 }
0x168e   :  { %v1222_v33 = vadd.f32 %v1218_v10, %v2960_v32 }
0x1690   :  { %2505 = vtanh.f32 %v1222_v33  ;;  %v2118_v35 = vmul.f32 -1.442695, %v1222_v33 }
0x1692   :  { %2507 = vpow2.f32 %v2118_v35 }
0x169d   :  { %v2506_v34 = vpop.eup %2505 }
0x169e   :  { %1232 = vrot.lane.b32.xlu1 %v2506_v34, %s2641_s10 }
0x169f   :  { %v2508_v36 = vpop.eup %2507 }
0x16a0   :  { %v1226_v37 = vadd.f32 1.0, %v2508_v36 }
0x16a2   :  { %2509 = vrcp.f32 %v1226_v37 }
0x16af   :  { %v2510_v38 = vpop.eup %2509 }
0x16b0   :  { %v1230_v43 = vmul.f32 0.0, %v2510_v38 }
0x1710   :  { %v1233_v39 = vpop.permute.xlu1 %1232 }
0x1711   :  { %v1235_v41 = vmul.f32 %v2510_v38, %v1233_v39 }
0x1713   :  { %1237 = vrot.lane.b32.xlu0 %v1235_v41, %s2642_s3 }
0x1785   :  { %v1238_v44 = vpop.permute.xlu0 %1237 }
0x1786   :  { %v1240_v45 = vadd.f32 %v1238_v44, %v1230_v43 }
0x1788   :  { %2511 = vtanh.f32 %v1240_v45  ;;  %v1334_v60 = vrot.slane %v1240_v45, 6 }
0x1795   :  { %v2512_v46 = vpop.eup %2511 }
0x1796   :  { %1243 = vrot.lane.b32.xlu1 %v2512_v46, %s2641_s10 }
0x1808   :  { %v1244_v47 = vpop.permute.xlu1 %1243 }
0x1809   :  { %v1246_v48 = vmul.f32 %v2510_v38, %v1244_v47 }
0x180b   :  { %1248 = vrot.lane.b32.xlu0 %v1246_v48, %s2642_s3 }
0x187d   :  { %v1249_v49 = vpop.permute.xlu0 %1248 }
0x187e   :  { %2353 = vmatmul.mubr.msk.f32.vlgmr.msra.gmra.mxu1 %vm203_vm9, %v1249_v49 }
0x187f   :  { %2367 = vmatpush3.msra.mxu1 %v2906_v20  ;;  %2374 = vmatprep.mubr.msk.f32.mxu1 %vm2640_vm0, %v2639_v0 }
0x1880   :  { %2368 = vmatprep.subr.mxu1 %v2639_v0 }
0x1881   :  { %2369 = vmatpush3.msra.mxu1 %v2909_v61 }
0x1882   :  { %2370 = vmatprep.subr.mxu1 %v2639_v0 }
0x1883   :  { %2371 = vmatpush3.msra.mxu1 %v2915_v22 }
0x1884   :  { %2372 = vmatprep.subr.mxu1 %v2639_v0 }
0x1885   :  { %2373 = vmatpush3.msra.mxu1 %v2926_v24 }
0x1886   :  { %2388 = vmatprep.subr.mxu1 %v2639_v0 }
0x193e   :  { %v1318_v50 = vpop.f32.mrf.mxu1 }
0x193f   :  { %v1323_v51 = vrot.slane %v1318_v50, 6 }
0x1940   :  { %v2354_v52 = vpop.f32.mrf.mxu1 }
0x1941   :  { %v1325_v53 = vadd.f32 %v1323_v51, %v2960_v32 }
0x1943   :  { %2513 = vtanh.f32 %v1325_v53  ;;  %v2120_v55 = vmul.f32 -1.442695, %v1325_v53 }
0x1945   :  { %2515 = vpow2.f32 %v2120_v55 }
0x1950   :  { %v2514_v54 = vpop.eup %2513 }
0x1951   :  { %1338 = vrot.lane.b32.xlu1 %v2514_v54, %s2641_s10 }
0x1952   :  { %v2516_v56 = vpop.eup %2515 }
0x1953   :  { %v1329_v57 = vadd.f32 1.0, %v2516_v56 }
0x1955   :  { %2517 = vrcp.f32 %v1329_v57 }
0x1962   :  { %v2518_v42 = vpop.eup %2517 }
0x1963   :  { %v1336_v62 = vmul.f32 %v2518_v42, %v1334_v60 }
0x19c3   :  { %v1339_v58 = vpop.permute.xlu1 %1338 }
0x19c4   :  { %v1341_v59 = vmul.f32 %v2518_v42, %v1339_v58 }
0x19c6   :  { %1343 = vrot.lane.b32.xlu0 %v1341_v59, %s2642_s3 }
0x1a38   :  { %v1344_v63 = vpop.permute.xlu0 %1343 }
0x1a39   :  { %v1346_v3 = vadd.f32 %v1344_v63, %v1336_v62 }
0x1a3b   :  { %2519 = vtanh.f32 %v1346_v3  ;;  %v1441_v23 = vrot.slane %v1346_v3, 6 }
0x1a48   :  { %v2520_v4 = vpop.eup %2519 }
0x1a49   :  { %1349 = vrot.lane.b32.xlu1 %v2520_v4, %s2641_s10 }
0x1abb   :  { %v1350_v5 = vpop.permute.xlu1 %1349 }
0x1abc   :  { %v1352_v6 = vmul.f32 %v2518_v42, %v1350_v5 }
0x1abe   :  { %v1354_v7 = vrot.slane %v1352_v6, 2 }
0x1ac0   :  { %1355 = vrot.lane.b32.xlu0 %v1354_v7, %s2642_s3 }
0x1b32   :  { %v1356_v8 = vpop.permute.xlu0 %1355 }
0x1b33   :  { %2364 = vmatmul.mubr.msk.f32.vlgmr.msra.gmra.mxu0 %vm203_vm9, %v1356_v8 }
0x1b34   :  { %2378 = vmatpush3.msra.mxu0 %v2906_v20  ;;  %2385 = vmatprep.mubr.msk.f32.mxu0 %vm2640_vm0, %v2639_v0 }
0x1b35   :  { %2379 = vmatprep.subr.mxu0 %v2639_v0 }
0x1b36   :  { %2380 = vmatpush3.msra.mxu0 %v2909_v61 }
0x1b37   :  { %2381 = vmatprep.subr.mxu0 %v2639_v0 }
0x1b38   :  { %2382 = vmatpush3.msra.mxu0 %v2915_v22 }
0x1b39   :  { %2383 = vmatprep.subr.mxu0 %v2639_v0 }
0x1b3a   :  { %2384 = vmatpush3.msra.mxu0 %v2926_v24 }
0x1b3b   :  { %2399 = vmatprep.subr.mxu0 %v2639_v0 }
0x1bf3   :  { %v1425_v9 = vpop.f32.mrf.mxu0 }
0x1bf4   :  { %v1430_v11 = vrot.slane %v1425_v9, 4 }
0x1bf5   :  { %v2365_v12 = vpop.f32.mrf.mxu0 }
0x1bf6   :  { %v1432_v13 = vadd.f32 %v1430_v11, %v2960_v32 }
0x1bf8   :  { %2521 = vtanh.f32 %v1432_v13  ;;  %v2122_v40 = vmul.f32 -1.442695, %v1432_v13 }
0x1bfa   :  { %2523 = vpow2.f32 %v2122_v40 }
0x1c05   :  { %v2522_v14 = vpop.eup %2521 }
0x1c06   :  { %1445 = vrot.lane.b32.xlu1 %v2522_v14, %s2641_s10 }
0x1c07   :  { %v2524_v15 = vpop.eup %2523 }
0x1c08   :  { %v1436_v16 = vadd.f32 1.0, %v2524_v15 }
0x1c0a   :  { %2525 = vrcp.f32 %v1436_v16 }
0x1c17   :  { %v2526_v17 = vpop.eup %2525 }
0x1c18   :  { %v1443_v1 = vmul.f32 %v2526_v17, %v1441_v23 }
0x1c78   :  { %v1446_v18 = vpop.permute.xlu1 %1445 }
0x1c79   :  { %v1448_v21 = vmul.f32 %v2526_v17, %v1446_v18 }
0x1c7b   :  { %1450 = vrot.lane.b32.xlu0 %v1448_v21, %s2642_s3 }
0x1ced   :  { %v1451_v25 = vpop.permute.xlu0 %1450 }
0x1cee   :  { %v1453_v2 = vadd.f32 %v1451_v25, %v1443_v1 }
0x1cf0   :  { %2527 = vtanh.f32 %v1453_v2  ;;  %v1548_v44 = vrot.slane %v1453_v2, 6 }
0x1cfd   :  { %v2528_v26 = vpop.eup %2527 }
0x1cfe   :  { %1456 = vrot.lane.b32.xlu1 %v2528_v26, %s2641_s10 }
0x1d70   :  { %v1457_v27 = vpop.permute.xlu1 %1456 }
0x1d71   :  { %v1459_v10 = vmul.f32 %v2526_v17, %v1457_v27 }
0x1d73   :  { %v1461_v28 = vrot.slane %v1459_v10, 4 }
0x1d75   :  { %1462 = vrot.lane.b32.xlu0 %v1461_v28, %s2642_s3 }
0x1de7   :  { %v1463_v29 = vpop.permute.xlu0 %1462 }
0x1de8   :  { %2375 = vmatmul.mubr.msk.f32.vlgmr.msra.gmra.mxu1 %vm203_vm9, %v1463_v29 }
0x1de9   :  { %2389 = vmatpush3.msra.mxu1 %v2906_v20  ;;  %2396 = vmatprep.mubr.msk.f32.mxu1 %vm2640_vm0, %v2639_v0 }
0x1dea   :  { %2390 = vmatprep.subr.mxu1 %v2639_v0 }
0x1deb   :  { %2391 = vmatpush3.msra.mxu1 %v2909_v61 }
0x1dec   :  { %2392 = vmatprep.subr.mxu1 %v2639_v0 }
0x1ded   :  { %2393 = vmatpush3.msra.mxu1 %v2915_v22 }
0x1dee   :  { %2394 = vmatprep.subr.mxu1 %v2639_v0 }
0x1def   :  { %2395 = vmatpush3.msra.mxu1 %v2926_v24 }
0x1df0   :  { %2410 = vmatprep.subr.mxu1 %v2639_v0 }
0x1ea8   :  { %v1532_v19 = vpop.f32.mrf.mxu1 }
0x1ea9   :  { %v1537_v31 = vrot.slane %v1532_v19, 2 }
0x1eaa   :  { %v2376_v33 = vpop.f32.mrf.mxu1 }
0x1eab   :  { %v1539_v34 = vadd.f32 %v1537_v31, %v2960_v32 }
0x1ead   :  { %2529 = vtanh.f32 %v1539_v34  ;;  %v2124_v36 = vmul.f32 -1.442695, %v1539_v34 }
0x1eaf   :  { %2531 = vpow2.f32 %v2124_v36 }
0x1eba   :  { %v2530_v35 = vpop.eup %2529 }
0x1ebb   :  { %1552 = vrot.lane.b32.xlu1 %v2530_v35, %s2641_s10 }
0x1ebc   :  { %v2532_v37 = vpop.eup %2531 }
0x1ebd   :  { %v1543_v38 = vadd.f32 1.0, %v2532_v37 }
0x1ebf   :  { %2533 = vrcp.f32 %v1543_v38 }
0x1ecc   :  { %v2534_v39 = vpop.eup %2533 }
0x1ecd   :  { %v1550_v45 = vmul.f32 %v2534_v39, %v1548_v44 }
0x1f2d   :  { %v1553_v41 = vpop.permute.xlu1 %1552 }
0x1f2e   :  { %v1555_v43 = vmul.f32 %v2534_v39, %v1553_v41 }
0x1f30   :  { %1557 = vrot.lane.b32.xlu0 %v1555_v43, %s2642_s3 }
0x1fa2   :  { %v1558_v46 = vpop.permute.xlu0 %1557 }
0x1fa3   :  { %v1560_v47 = vadd.f32 %v1558_v46, %v1550_v45 }
0x1fa5   :  { %2535 = vtanh.f32 %v1560_v47  ;;  %v1652_v62 = vrot.slane %v1560_v47, 6 }
0x1fb2   :  { %v2536_v32 = vpop.eup %2535 }
0x1fb3   :  { %1563 = vrot.lane.b32.xlu1 %v2536_v32, %s2641_s10 }
0x2025   :  { %v1564_v48 = vpop.permute.xlu1 %1563 }
0x2026   :  { %v1566_v49 = vmul.f32 %v2534_v39, %v1564_v48 }
0x2028   :  { %v1568_v50 = vrot.slane %v1566_v49, 6 }
0x202a   :  { %1569 = vrot.lane.b32.xlu0 %v1568_v50, %s2642_s3 }
0x209c   :  { %v1570_v51 = vpop.permute.xlu0 %1569 }
0x209d   :  { %2386 = vmatmul.mubr.msk.f32.vlgmr.msra.gmra.mxu0 %vm203_vm9, %v1570_v51 }
0x209e   :  { %2400 = vmatpush3.msra.mxu0 %v2906_v20  ;;  %2407 = vmatprep.mubr.msk.f32.mxu0 %vm2640_vm0, %v2639_v0 }
0x209f   :  { %2401 = vmatprep.subr.mxu0 %v2639_v0 }
0x20a0   :  { %2402 = vmatpush3.msra.mxu0 %v2909_v61 }
0x20a1   :  { %2403 = vmatprep.subr.mxu0 %v2639_v0 }
0x20a2   :  { %2404 = vmatpush3.msra.mxu0 %v2915_v22 }
0x20a3   :  { %2405 = vmatprep.subr.mxu0 %v2639_v0 }
0x20a4   :  { %2406 = vmatpush3.msra.mxu0 %v2926_v24 }
0x20a5   :  { %2421 = vmatprep.subr.mxu0 %v2639_v0 }
0x215d   :  { %v1639_v52 = vpop.f32.mrf.mxu0 }
0x215e   :  { %v1643_v53 = vadd.f32 %v1639_v52, %v2958_v30 }
0x215f   :  { %v2387_v54 = vpop.f32.mrf.mxu0 }
0x2160   :  { %2537 = vtanh.f32 %v1643_v53  ;;  %v2126_v56 = vmul.f32 -1.442695, %v1643_v53 }
0x2162   :  { %2539 = vpow2.f32 %v2126_v56 }
0x216d   :  { %v2538_v55 = vpop.eup %2537 }
0x216e   :  { %1656 = vrot.lane.b32.xlu1 %v2538_v55, %s2641_s10 }
0x216f   :  { %v2540_v57 = vpop.eup %2539 }
0x2170   :  { %v1647_v42 = vadd.f32 1.0, %v2540_v57 }
0x2172   :  { %2541 = vrcp.f32 %v1647_v42 }
0x217f   :  { %v2542_v58 = vpop.eup %2541 }
0x2180   :  { %v1654_v63 = vmul.f32 %v2542_v58, %v1652_v62 }
0x21e0   :  { %v1657_v59 = vpop.permute.xlu1 %1656 }
0x21e1   :  { %v1659_v60 = vmul.f32 %v2542_v58, %v1657_v59 }
0x21e3   :  { %1661 = vrot.lane.b32.xlu0 %v1659_v60, %s2642_s3 }
0x2255   :  { %v1662_v3 = vpop.permute.xlu0 %1661 }
0x2256   :  { %v1664_v4 = vadd.f32 %v1662_v3, %v1654_v63  ;;  %v1993_v63 = vld [vmem:[%s3089_s7 + $0x10] sm:$0xff]  ;;  %v1992_v3 = vld [vmem:[%s3089_s7 + $0x8] sm:$0xff] }
0x2258   :  { %2543 = vtanh.f32 %v1664_v4 }
0x2265   :  { %v2544_v5 = vpop.eup %2543 }
0x2266   :  { %1667 = vrot.lane.b32.xlu1 %v2544_v5, %s2641_s10 }
0x22d8   :  { %v1668_v6 = vpop.permute.xlu1 %1667 }
0x22d9   :  { %v1670_v7 = vmul.f32 %v2542_v58, %v1668_v6 }
0x22db   :  { %1672 = vrot.lane.b32.xlu0 %v1670_v7, %s2642_s3 }
0x234d   :  { %v1673_v8 = vpop.permute.xlu0 %1672 }
0x234e   :  { %2397 = vmatmul.mubr.msk.f32.vlgmr.msra.gmra.mxu1 %vm203_vm9, %v1673_v8 }
0x234f   :  { %2411 = vmatpush3.msra.mxu1 %v2906_v20  ;;  %2418 = vmatprep.mubr.msk.f32.mxu1 %vm2640_vm0, %v2639_v0 }
0x2350   :  { %2412 = vmatprep.subr.mxu1 %v2639_v0 }
0x2351   :  { %2413 = vmatpush3.msra.mxu1 %v2909_v61 }
0x2352   :  { %2414 = vmatprep.subr.mxu1 %v2639_v0 }
0x2353   :  { %2415 = vmatpush3.msra.mxu1 %v2915_v22 }
0x2354   :  { %2416 = vmatprep.subr.mxu1 %v2639_v0 }
0x2355   :  { %2417 = vmatpush3.msra.mxu1 %v2926_v24  ;;  %v1758_v24 = vrot.slane %v1664_v4, 6  ;;  %v1991_v4 = vld [vmem:[%s3089_s7] sm:$0xff] }
0x240e   :  { %v1742_v9 = vpop.f32.mrf.mxu1 }
0x240f   :  { %v1747_v11 = vrot.slane %v1742_v9, 6 }
0x2410   :  { %v2398_v12 = vpop.f32.mrf.mxu1 }
0x2411   :  { %v1749_v20 = vadd.f32 %v1747_v11, %v2958_v30  ;;  %v2133_v11 = vld [vmem:[%s3090_s8] ss:$0 sm:$0xff] }
0x2413   :  { %2545 = vtanh.f32 %v1749_v20  ;;  %v2128_v14 = vmul.f32 -1.442695, %v1749_v20 }
0x2415   :  { %2547 = vpow2.f32 %v2128_v14 }
0x2420   :  { %v2546_v13 = vpop.eup %2545 }
0x2421   :  { %1762 = vrot.lane.b32.xlu1 %v2546_v13, %s2641_s10 }
0x2422   :  { %v2548_v61 = vpop.eup %2547 }
0x2423   :  { %v1753_v40 = vadd.f32 1.0, %v2548_v61 }
0x2425   :  { %2549 = vrcp.f32 %v1753_v40 }
0x2432   :  { %v2550_v15 = vpop.eup %2549 }
0x2433   :  { %v1760_v17 = vmul.f32 %v2550_v15, %v1758_v24 }
0x2493   :  { %v1763_v22 = vpop.permute.xlu1 %1762 }
0x2494   :  { %v1765_v16 = vmul.f32 %v2550_v15, %v1763_v22 }
0x2496   :  { %1767 = vrot.lane.b32.xlu0 %v1765_v16, %s2642_s3 }
0x2508   :  { %v1768_v18 = vpop.permute.xlu0 %1767 }
0x2509   :  { %v1770_v21 = vadd.f32 %v1768_v18, %v1760_v17 }
0x250b   :  { %2551 = vtanh.f32 %v1770_v21  ;;  %v1865_v38 = vrot.slane %v1770_v21, 6 }
0x2518   :  { %v2552_v23 = vpop.eup %2551 }
0x2519   :  { %1773 = vrot.lane.b32.xlu1 %v2552_v23, %s2641_s10 }
0x258b   :  { %v1774_v1 = vpop.permute.xlu1 %1773 }
0x258c   :  { %v1776_v25 = vmul.f32 %v2550_v15, %v1774_v1 }
0x258e   :  { %v1778_v2 = vrot.slane %v1776_v25, 2 }
0x2590   :  { %1779 = vrot.lane.b32.xlu0 %v1778_v2, %s2642_s3 }
0x2602   :  { %v1780_v26 = vpop.permute.xlu0 %1779 }
0x2603   :  { %2408 = vmatmul.mubr.msk.f32.vlgmr.msra.gmra.mxu0 %vm203_vm9, %v1780_v26 }
0x2604   :  { %2429 = vmatprep.mubr.msk.f32.mxu0 %vm2640_vm0, %v2639_v0 }
0x26c3   :  { %v1849_v27 = vpop.f32.mrf.mxu0 }
0x26c4   :  { %v1854_v10 = vrot.slane %v1849_v27, 4 }
0x26c5   :  { %v2409_v28 = vpop.f32.mrf.mxu0 }
0x26c6   :  { %v1856_v29 = vadd.f32 %v1854_v10, %v2958_v30 }
0x26c8   :  { %2553 = vtanh.f32 %v1856_v29  ;;  %v2130_v31 = vmul.f32 -1.442695, %v1856_v29 }
0x26ca   :  { %2555 = vpow2.f32 %v2130_v31 }
0x26d5   :  { %v2554_v19 = vpop.eup %2553 }
0x26d6   :  { %1869 = vrot.lane.b32.xlu1 %v2554_v19, %s2641_s10 }
0x26d7   :  { %v2556_v33 = vpop.eup %2555 }
0x26d8   :  { %v1860_v34 = vadd.f32 1.0, %v2556_v33 }
0x26da   :  { %2557 = vrcp.f32 %v1860_v34 }
0x26e7   :  { %v2558_v35 = vpop.eup %2557 }
0x26e8   :  { %v1867_v39 = vmul.f32 %v2558_v35, %v1865_v38 }
0x2748   :  { %v1870_v36 = vpop.permute.xlu1 %1869 }
0x2749   :  { %v1872_v37 = vmul.f32 %v2558_v35, %v1870_v36 }
0x274b   :  { %1874 = vrot.lane.b32.xlu0 %v1872_v37, %s2642_s3 }
0x27bd   :  { %v1875_v41 = vpop.permute.xlu0 %1874 }
0x27be   :  { %v1877_v43 = vadd.f32 %v1875_v41, %v1867_v39 }
0x27c0   :  { %2559 = vtanh.f32 %v1877_v43  ;;  %v1972_v58 = vrot.slane %v1877_v43, 6 }
0x27cd   :  { %v2560_v44 = vpop.eup %2559 }
0x27ce   :  { %1880 = vrot.lane.b32.xlu1 %v2560_v44, %s2641_s10 }
0x2840   :  { %v1881_v45 = vpop.permute.xlu1 %1880 }
0x2841   :  { %v1883_v46 = vmul.f32 %v2558_v35, %v1881_v45 }
0x2843   :  { %v1885_v47 = vrot.slane %v1883_v46, 4 }
0x2845   :  { %1886 = vrot.lane.b32.xlu0 %v1885_v47, %s2642_s3 }
0x28b7   :  { %v1887_v32 = vpop.permute.xlu0 %1886 }
0x28b8   :  { %2419 = vmatmul.mubr.msk.f32.vlgmr.msra.gmra.mxu1 %vm203_vm9, %v1887_v32 }
0x2978   :  { %v1956_v48 = vpop.f32.mrf.mxu1 }
0x2979   :  { %v1961_v49 = vrot.slane %v1956_v48, 2 }
0x297a   :  { %v2420_v50 = vpop.f32.mrf.mxu1 }
0x297b   :  { %v1963_v51 = vadd.f32 %v1961_v49, %v2958_v30  ;;  %v1994_v30 = vld [vmem:[%s3089_s7 + $0x18] sm:$0xff]  ;;  %s2643_s7 = smov [#allocation7]  }
0x297c   :  { %2422 = vmatpush3.msra.mxu0 %v1994_v30  ;;  %s2086_s27 = sshll.u32 %s2643_s7, 4  ;;  %s2087_s27 = int_to_ptr.vmem [resolvable:$true] %s2086_s27 }
0x297d   :  { %2561 = vtanh.f32 %v1963_v51  ;;  %v2132_v53 = vmul.f32 -1.442695, %v1963_v51  ;;  %2423 = vmatprep.subr.mxu0 %v2639_v0  ;;  %s2609_s28 = scalar_lea.vmem %s2087_s27, 32  ;;  %p2614_p11 = scmp.lt.s32.totalorder %s2087_s27, %s2087_s27 }
0x297e   :  { %2424 = vmatpush3.msra.mxu0 %v1993_v63  ;;  %p2610_p10 = scmp.ne.s32.totalorder %s2087_s27, %s2609_s28  ;;  %p2615_p12 = scmp.lt.s32.totalorder %s2609_s28, %s2609_s28 }
0x297f   :  { %2563 = vpow2.f32 %v2132_v53  ;;  %2425 = vmatprep.subr.mxu0 %v2639_v0 }
0x2980   :  { %2426 = vmatpush3.msra.mxu0 %v1992_v3  ;;  %p2616_p13 = por %p2615_p12, %p2614_p11 }
0x2981   :  { %2427 = vmatprep.subr.mxu0 %v2639_v0 }
0x2982   :  { %2428 = vmatpush3.msra.mxu0 %v1991_v4  ;;  %p2617_p0 = pnand %p2616_p13, %p2610_p10 }
0x298a   :  { %v2562_v52 = vpop.eup %2561 }
0x298b   :  { %1976 = vrot.lane.b32.xlu1 %v2562_v52, %s2641_s10 }
0x298c   :  { %v2564_v54 = vpop.eup %2563 }
0x298d   :  { %v1967_v55 = vadd.f32 1.0, %v2564_v54 }
0x298f   :  { %2565 = vrcp.f32 %v1967_v55 }
0x299c   :  { %v2566_v56 = vpop.eup %2565 }
0x299d   :  { %v1974_v59 = vmul.f32 %v2566_v56, %v1972_v58 }
0x29fd   :  { %v1977_v57 = vpop.permute.xlu1 %1976 }
0x29fe   :  { %v1979_v42 = vmul.f32 %v2566_v56, %v1977_v57 }
0x2a00   :  { %1981 = vrot.lane.b32.xlu0 %v1979_v42, %s2642_s3 }
0x2a72   :  { %v1982_v60 = vpop.permute.xlu0 %1981 }
0x2a73   :  { %v1984_v62 = vadd.f32 %v1982_v60, %v1974_v59 }
0x2a75   :  { %2567 = vtanh.f32 %v1984_v62 }
0x2a82   :  { %v2568_v5 = vpop.eup %2567 }
0x2a83   :  { %1987 = vrot.lane.b32.xlu1 %v2568_v5, %s2641_s10 }
0x2af5   :  { %v1988_v6 = vpop.permute.xlu1 %1987 }
0x2af6   :  { %v1990_v7 = vmul.f32 %v2566_v56, %v1988_v6 }
0x2af8   :  { %v2003_v8 = vrot.slane %v1990_v7, 6 }
0x2afa   :  { %2004 = vrot.lane.b32.xlu0 %v2003_v8, %s2642_s3 }
0x2b6c   :  { %v2005_v9 = vpop.permute.xlu0 %2004 }
0x2b6d   :  { %2430 = vmatmul.mubr.msk.f32.vlgmr.msra.gmra.mxu0 %vm203_vm9, %v2005_v9 }
0x2c2d   :  { %v2074_v12 = vpop.f32.mrf.mxu0 }
0x2c2e   :  { %v2075_v0 = vadd.f32 %v2133_v11, %v2074_v12 }
0x2c2f   :  { %v2431_v20 = vpop.f32.mrf.mxu0 }
0x2c30   :  { %2079 = vst.msk [vmem:[#allocation7] sm:$0x3] %vm2078_vm10, %v2075_v0 }
0x2c31   :  { %2620 = shalt.err (!%p2617_p0)
}
0x2c32   :  { %2089 = dma.vmem_to_hbm [thread:$0]  %s2087_s27, 32, %s3091_s9, [#allocation4]  }
0x2c33   :  { %2633 = dma.done.wait [#allocation4], 32  }
0x2c34   :  { %2634 = vsyncadd [#allocation4], 4294967264 }
0x2c35   :  { %2093 = vsyncpa [#allocation3], 1 }
0x2c36   :  { %2094 = vsyncpa [#allocation6], 1 }
0x2c37   :  { %2095 = vsyncpa [#allocation4], 1 }

</bundles_post_ra>
